<compile_context>
chip_gen: v6e
topology: v6e:2x2x1
jax: 0.10.0
libtpu: 0.0.40
codegen_flags: <defaults>
</compile_context>

<pallas_src>
import jax
import jax.numpy as jnp
from jax import lax
from jax.experimental import pallas as pl
from jax.experimental.pallas import tpu as pltpu


def fusing_kernel(u_ref, i_ref, o_ref, w1_ref, b1_ref, w2_ref, out_ref):
    # u/i/o_ref : [tB, E] batch tile of each embedding source
    # w1_ref    : [E, E]  nn.Linear(E, E) weight, PyTorch (out, in) layout
    # b1_ref    : [1, E]
    # w2_ref    : [1, E]  row of the nn.Linear(E, 1) weight
    # out_ref   : [tB, E]
    w1 = w1_ref[...]
    b1 = b1_ref[...].astype(jnp.float32)
    w2 = w2_ref[...].astype(jnp.float32)

    def logit(x):
        # x @ W1.T without materializing a transposed copy of W1: contract
        # over W1's axis 1.  f32 accumulation on the MXU.
        h = lax.dot_general(
            x, w1,
            dimension_numbers=(((1,), (1,)), ((), ())),
            preferred_element_type=jnp.float32,
        )
        h = jnp.maximum(h + b1, 0.0)                        # [tB, E] f32
        # Linear(E, 1) as a VPU multiply + lane (XLU) reduction: keeps the
        # MXU free and avoids a masked 1-lane result pop.  b2 is omitted: it
        # shifts all three logits equally and cancels under the softmax.
        return jnp.sum(h * w2, axis=-1, keepdims=True)      # [tB, 1] f32

    x0 = u_ref[...].astype(jnp.float32)
    x1 = i_ref[...].astype(jnp.float32)
    x2 = o_ref[...].astype(jnp.float32)

    l0 = logit(x0)
    l1 = logit(x1)
    l2 = logit(x2)

    # Softmax over the 3 sources, per batch row (f32 throughout).  The
    # max-subtraction keeps exp bounded even for garbage rows in a ragged
    # last tile (those rows are discarded by the masked output write).
    m = jnp.maximum(jnp.maximum(l0, l1), l2)
    e0 = jnp.exp(l0 - m)
    e1 = jnp.exp(l1 - m)
    e2 = jnp.exp(l2 - m)
    inv = 1.0 / (e0 + e1 + e2)

    out = (e0 * x0 + e1 * x1 + e2 * x2) * inv               # [tB, E] f32
    out_ref[...] = out.astype(out_ref.dtype)


def _build_call(B, E, tile_b, dtype, *, single_buffer_weights):
    grid = (pl.cdiv(B, tile_b),)

    emb_spec = pl.BlockSpec((tile_b, E), lambda i: (i, 0))

    def invariant(shape):
        if single_buffer_weights:
            # Constant index_map -> single buffer is enough; saves one copy
            # of W1/b1/W2 in VMEM (matters at production E on v7x's 64 MiB).
            return pl.BlockSpec(shape, lambda i: (0, 0),
                                pipeline_mode=pl.Buffered(1))
        return pl.BlockSpec(shape, lambda i: (0, 0))

    # Scoped-VMEM estimate for this tile: double-buffered embeddings/output,
    # weights, and f32 temporaries.  Only override the per-generation scoped
    # default when we actually need more (keeps small-shape runs on the
    # stock, always-safe limit); cap far below v7x's 64 MiB physical VMEM.
    item = jnp.dtype(dtype).itemsize
    w_copies = 1 if single_buffer_weights else 2
    est = (2 * 3 * tile_b * E * item        # 3 inputs, double buffered
           + 2 * tile_b * E * item          # output, double buffered
           + w_copies * E * E * 4           # W1
           + 4 * E * 4                      # b1, w2 (padded rows)
           + 6 * tile_b * E * 4)            # f32 temps (h, exp, weighted sum)
    vmem_limit = None
    if est > 14 * 1024 * 1024:
        vmem_limit = min(int(est * 1.5), 56 * 1024 * 1024)

    return pl.pallas_call(
        fusing_kernel,
        out_shape=jax.ShapeDtypeStruct((B, E), dtype),
        grid=grid,
        in_specs=[emb_spec, emb_spec, emb_spec,
                  invariant((E, E)), invariant((1, E)), invariant((1, E))],
        out_specs=pl.BlockSpec((tile_b, E), lambda i: (i, 0)),
        compiler_params=pltpu.CompilerParams(
            dimension_semantics=("parallel",),
            vmem_limit_bytes=vmem_limit,
        ),
    )


def embedding_fusing(user_dy, item_dy, itm_ori, W1, b1, W2, b2, *, tile_b=None):
    """Pallas wrapper.  W1: [E, E], b1: [E], W2: [1, E], b2: [1] (PyTorch layout).

    b2 is accepted for interface parity but intentionally NOT used: the
    softmax over the 3 stacked sources is shift-invariant, so adding the same
    scalar to all three logits changes nothing.
    """
    del b2  # softmax shift invariance (documented above)
    B, E = user_dy.shape
    dtype = user_dy.dtype

    # Sublane alignment for the batch tile: 8 rows for 32-bit storage,
    # 16 for 16-bit packing — unless the tile spans the whole batch.
    sub = 8 if jnp.dtype(dtype).itemsize >= 4 else 16

    if tile_b is None:
        # Big tiles amortize the ~0.35us/step overhead (memory-bound kernel),
        # but keep >= 2 grid steps when the batch allows it so v7x can shard
        # the "parallel" batch axis over its 2 TensorCores.
        tile_b = min(1024, B)
        if tile_b == B and B >= 2 * sub:
            tile_b = ((B + 1) // 2 + sub - 1) // sub * sub
    tile_b = min(tile_b, B)
    if tile_b != B:
        tile_b = max(sub, (tile_b // sub) * sub)   # (8,128) BlockSpec rule

    args = (
        user_dy, item_dy, itm_ori,
        W1,                          # [E, E], no transposed copy
        b1.reshape(1, E),            # [1, E]
        W2.reshape(1, E),            # [1, E]
    )

    try:
        call = _build_call(B, E, tile_b, dtype, single_buffer_weights=True)
        return call(*args)
    except Exception:
        # Fallback for jax versions without BlockSpec(pipeline_mode=...) /
        # pl.Buffered; only costs an extra buffered copy of W1/b1/W2.
        call = _build_call(B, E, tile_b, dtype, single_buffer_weights=False)
        return call(*args)


def xavier_uniform(key, shape):
    fan_out, fan_in = shape
    bound = jnp.sqrt(6.0 / (fan_in + fan_out))
    return jax.random.uniform(key, shape, jnp.float32, -bound, bound)


def ref_forward(u, i, o, W1, b1, W2, b2):
    stack = jnp.stack([u, i, o], axis=0)                      # [3, B, E]
    h = jnp.maximum(
        jnp.einsum("sbe,oe->sbo", stack, W1,
                   precision=lax.Precision.HIGHEST) + b1, 0.0)
    logits = jnp.einsum("sbe,oe->sbo", h, W2,
                        precision=lax.Precision.HIGHEST) + b2  # [3, B, 1]
    scores = jax.nn.softmax(logits, axis=0)                    # over sources
    return jnp.sum(scores * stack, axis=0)                     # [B, E]


if __name__ == "__main__":
    B, E = 64, 128          # batch, embedding_size (lane-dense E)
    TILE_B = 16             # 4 grid steps -> exercises the pipelined tiling

    key = jax.random.PRNGKey(0)
    k_u, k_i, k_o, k_w1, k_w2 = jax.random.split(key, 5)

    user_dy = jax.random.normal(k_u, (B, E), jnp.float32)
    item_dy = jax.random.normal(k_i, (B, E), jnp.float32)
    itm_ori = jax.random.normal(k_o, (B, E), jnp.float32)

    # nn.Linear(E, E): weight [E, E] (xavier uniform), bias [E] (zeros)
    W1 = xavier_uniform(k_w1, (E, E))
    b1 = jnp.zeros((E,), jnp.float32)
    # nn.Linear(E, 1): weight [1, E] (xavier uniform), bias [1] (zeros)
    W2 = xavier_uniform(k_w2, (1, E))
    b2 = jnp.zeros((1,), jnp.float32)

    ref = ref_forward(user_dy, item_dy, itm_ori, W1, b1, W2, b2)

    # Explicit small tile -> multi-step pipelined grid.
    out = embedding_fusing(user_dy, item_dy, itm_ori, W1, b1, W2, b2,
                           tile_b=TILE_B)
    out = jax.block_until_ready(out)
    assert out.shape == (B, E)
    assert jnp.allclose(out, ref, atol=1e-3, rtol=1e-3), (
        f"mismatch vs reference, max abs err {jnp.max(jnp.abs(out - ref))}")

    # Default (large-tile, auto-aligned) path.
    out2 = jax.block_until_ready(
        embedding_fusing(user_dy, item_dy, itm_ori, W1, b1, W2, b2))
    assert jnp.allclose(out2, ref, atol=1e-3, rtol=1e-3), (
        f"mismatch vs reference, max abs err {jnp.max(jnp.abs(out2 - ref))}")

    print("KERNEL_OK")
</pallas_src>

<mosaic_0001>
module attributes {stable_mosaic.version = 11 : i64} {
  func.func @fusing_kernel(%arg0: i32, %arg1: memref<16x128xf32, #tpu.memory_space<vmem>>, %arg2: memref<16x128xf32, #tpu.memory_space<vmem>>, %arg3: memref<16x128xf32, #tpu.memory_space<vmem>>, %arg4: memref<128x128xf32, #tpu.memory_space<vmem>>, %arg5: memref<1x128xf32, #tpu.memory_space<vmem>>, %arg6: memref<1x128xf32, #tpu.memory_space<vmem>>, %arg7: memref<16x128xf32, #tpu.memory_space<vmem>>) attributes {dimension_semantics = [#tpu.dimension_semantics<parallel>], iteration_bounds = array<i64: 4>, scalar_prefetch = 0 : i64, scratch_operands = 0 : i64, tpu.core_type = #tpu.core_type<tc>, window_params = [{transform_indices = @transform_0, window_bounds = array<i64: 16, 128>}, {transform_indices = @transform_1, window_bounds = array<i64: 16, 128>}, {transform_indices = @transform_2, window_bounds = array<i64: 16, 128>}, {pipeline_mode = #tpu.pipeline_mode<synchronous>, transform_indices = @transform_3, window_bounds = array<i64: 128, 128>}, {pipeline_mode = #tpu.pipeline_mode<synchronous>, transform_indices = @transform_4, window_bounds = array<i64: 1, 128>}, {pipeline_mode = #tpu.pipeline_mode<synchronous>, transform_indices = @transform_5, window_bounds = array<i64: 1, 128>}, {transform_indices = @transform_6, window_bounds = array<i64: 16, 128>}]} {
    %c0 = arith.constant 0 : index
    %c0_0 = arith.constant 0 : index
    %0 = vector.load %arg4[%c0, %c0_0] : memref<128x128xf32, #tpu.memory_space<vmem>>, vector<128x128xf32>
    %c0_1 = arith.constant 0 : index
    %c0_2 = arith.constant 0 : index
    %1 = vector.load %arg5[%c0_1, %c0_2] : memref<1x128xf32, #tpu.memory_space<vmem>>, vector<1x128xf32>
    %c0_3 = arith.constant 0 : index
    %c0_4 = arith.constant 0 : index
    %2 = vector.load %arg6[%c0_3, %c0_4] : memref<1x128xf32, #tpu.memory_space<vmem>>, vector<1x128xf32>
    %c0_5 = arith.constant 0 : index
    %c0_6 = arith.constant 0 : index
    %3 = vector.load %arg1[%c0_5, %c0_6] : memref<16x128xf32, #tpu.memory_space<vmem>>, vector<16x128xf32>
    %c0_7 = arith.constant 0 : index
    %c0_8 = arith.constant 0 : index
    %4 = vector.load %arg2[%c0_7, %c0_8] : memref<16x128xf32, #tpu.memory_space<vmem>>, vector<16x128xf32>
    %c0_9 = arith.constant 0 : index
    %c0_10 = arith.constant 0 : index
    %5 = vector.load %arg3[%c0_9, %c0_10] : memref<16x128xf32, #tpu.memory_space<vmem>>, vector<16x128xf32>
    %cst = arith.constant dense<0.000000e+00> : vector<16x128xf32>
    %6 = tpu.matmul %3, %0, %cst {dimension_numbers = #tpu.dot_dimension_numbers<[1], [1], [0], [0], [0, 0, 1, 0], [], []>} : vector<16x128xf32>, vector<128x128xf32>, vector<16x128xf32> -> vector<16x128xf32>
    %7 = vector.broadcast %1 : vector<1x128xf32> to vector<16x128xf32>
    %8 = arith.addf %6, %7 : vector<16x128xf32>
    %cst_11 = arith.constant 0.000000e+00 : f32
    %9 = vector.broadcast %cst_11 : f32 to vector<16x128xf32>
    %10 = arith.maximumf %8, %9 : vector<16x128xf32>
    %11 = vector.broadcast %2 : vector<1x128xf32> to vector<16x128xf32>
    %12 = arith.mulf %10, %11 : vector<16x128xf32>
    %cst_12 = arith.constant dense<0.000000e+00> : vector<16xf32>
    %13 = vector.multi_reduction <add>, %12, %cst_12 [1] : vector<16x128xf32> to vector<16xf32>
    %14 = vector.shape_cast %13 : vector<16xf32> to vector<16x1xf32>
    %cst_13 = arith.constant dense<0.000000e+00> : vector<16x128xf32>
    %15 = tpu.matmul %4, %0, %cst_13 {dimension_numbers = #tpu.dot_dimension_numbers<[1], [1], [0], [0], [0, 0, 1, 0], [], []>} : vector<16x128xf32>, vector<128x128xf32>, vector<16x128xf32> -> vector<16x128xf32>
    %16 = vector.broadcast %1 : vector<1x128xf32> to vector<16x128xf32>
    %17 = arith.addf %15, %16 : vector<16x128xf32>
    %cst_14 = arith.constant 0.000000e+00 : f32
    %18 = vector.broadcast %cst_14 : f32 to vector<16x128xf32>
    %19 = arith.maximumf %17, %18 : vector<16x128xf32>
    %20 = vector.broadcast %2 : vector<1x128xf32> to vector<16x128xf32>
    %21 = arith.mulf %19, %20 : vector<16x128xf32>
    %cst_15 = arith.constant dense<0.000000e+00> : vector<16xf32>
    %22 = vector.multi_reduction <add>, %21, %cst_15 [1] : vector<16x128xf32> to vector<16xf32>
    %23 = vector.shape_cast %22 : vector<16xf32> to vector<16x1xf32>
    %cst_16 = arith.constant dense<0.000000e+00> : vector<16x128xf32>
    %24 = tpu.matmul %5, %0, %cst_16 {dimension_numbers = #tpu.dot_dimension_numbers<[1], [1], [0], [0], [0, 0, 1, 0], [], []>} : vector<16x128xf32>, vector<128x128xf32>, vector<16x128xf32> -> vector<16x128xf32>
    %25 = vector.broadcast %1 : vector<1x128xf32> to vector<16x128xf32>
    %26 = arith.addf %24, %25 : vector<16x128xf32>
    %cst_17 = arith.constant 0.000000e+00 : f32
    %27 = vector.broadcast %cst_17 : f32 to vector<16x128xf32>
    %28 = arith.maximumf %26, %27 : vector<16x128xf32>
    %29 = vector.broadcast %2 : vector<1x128xf32> to vector<16x128xf32>
    %30 = arith.mulf %28, %29 : vector<16x128xf32>
    %cst_18 = arith.constant dense<0.000000e+00> : vector<16xf32>
    %31 = vector.multi_reduction <add>, %30, %cst_18 [1] : vector<16x128xf32> to vector<16xf32>
    %32 = vector.shape_cast %31 : vector<16xf32> to vector<16x1xf32>
    %33 = arith.maximumf %14, %23 : vector<16x1xf32>
    %34 = arith.maximumf %33, %32 : vector<16x1xf32>
    %35 = arith.subf %14, %34 : vector<16x1xf32>
    %36 = math.exp %35 : vector<16x1xf32>
    %37 = arith.subf %23, %34 : vector<16x1xf32>
    %38 = math.exp %37 : vector<16x1xf32>
    %39 = arith.subf %32, %34 : vector<16x1xf32>
    %40 = math.exp %39 : vector<16x1xf32>
    %41 = arith.addf %36, %38 : vector<16x1xf32>
    %42 = arith.addf %41, %40 : vector<16x1xf32>
    %cst_19 = arith.constant 1.000000e+00 : f32
    %43 = vector.broadcast %cst_19 : f32 to vector<16x1xf32>
    %44 = arith.divf %43, %42 : vector<16x1xf32>
    %45 = vector.broadcast %36 : vector<16x1xf32> to vector<16x128xf32>
    %46 = arith.mulf %45, %3 : vector<16x128xf32>
    %47 = vector.broadcast %38 : vector<16x1xf32> to vector<16x128xf32>
    %48 = arith.mulf %47, %4 : vector<16x128xf32>
    %49 = arith.addf %46, %48 : vector<16x128xf32>
    %50 = vector.broadcast %40 : vector<16x1xf32> to vector<16x128xf32>
    %51 = arith.mulf %50, %5 : vector<16x128xf32>
    %52 = arith.addf %49, %51 : vector<16x128xf32>
    %53 = vector.broadcast %44 : vector<16x1xf32> to vector<16x128xf32>
    %54 = arith.mulf %52, %53 : vector<16x128xf32>
    %c0_20 = arith.constant 0 : index
    %c0_21 = arith.constant 0 : index
    %55 = vector.load %arg7[%c0_20, %c0_21] : memref<16x128xf32, #tpu.memory_space<vmem>>, vector<16x128xf32>
    tpu.vector_store %arg7[%c0_20, %c0_21], %54 {strides = array<i32>} : memref<16x128xf32, #tpu.memory_space<vmem>>, vector<16x128xf32>,
    return
  }
  func.func @transform_0(%arg0: i32) -> (i32, i32) {
    %c0_i32 = arith.constant 0 : i32
    %c0_i32_0 = arith.constant 0 : i32
    return %arg0, %c0_i32 : i32, i32
  }
  func.func @transform_1(%arg0: i32) -> (i32, i32) {
    %c0_i32 = arith.constant 0 : i32
    %c0_i32_0 = arith.constant 0 : i32
    return %arg0, %c0_i32 : i32, i32
  }
  func.func @transform_2(%arg0: i32) -> (i32, i32) {
    %c0_i32 = arith.constant 0 : i32
    %c0_i32_0 = arith.constant 0 : i32
    return %arg0, %c0_i32 : i32, i32
  }
  func.func @transform_3(%arg0: i32) -> (i32, i32) {
    %c0_i32 = arith.constant 0 : i32
    %c0_i32_0 = arith.constant 0 : i32
    %c0_i32_1 = arith.constant 0 : i32
    return %c0_i32, %c0_i32_0 : i32, i32
  }
  func.func @transform_4(%arg0: i32) -> (i32, i32) {
    %c0_i32 = arith.constant 0 : i32
    %c0_i32_0 = arith.constant 0 : i32
    %c0_i32_1 = arith.constant 0 : i32
    return %c0_i32, %c0_i32_0 : i32, i32
  }
  func.func @transform_5(%arg0: i32) -> (i32, i32) {
    %c0_i32 = arith.constant 0 : i32
    %c0_i32_0 = arith.constant 0 : i32
    %c0_i32_1 = arith.constant 0 : i32
    return %c0_i32, %c0_i32_0 : i32, i32
  }
  func.func @transform_6(%arg0: i32) -> (i32, i32) {
    %c0_i32 = arith.constant 0 : i32
    %c0_i32_0 = arith.constant 0 : i32
    return %arg0, %c0_i32 : i32, i32
  }
}

module attributes {stable_mosaic.version = 11 : i64} {
  func.func @fusing_kernel(%arg0: i32, %arg1: memref<16x128xf32, #tpu.memory_space<vmem>>, %arg2: memref<16x128xf32, #tpu.memory_space<vmem>>, %arg3: memref<16x128xf32, #tpu.memory_space<vmem>>, %arg4: memref<128x128xf32, #tpu.memory_space<vmem>>, %arg5: memref<1x128xf32, #tpu.memory_space<vmem>>, %arg6: memref<1x128xf32, #tpu.memory_space<vmem>>, %arg7: memref<16x128xf32, #tpu.memory_space<vmem>>) attributes {dimension_semantics = [#tpu.dimension_semantics<parallel>], iteration_bounds = array<i64: 4>, scalar_prefetch = 0 : i64, scratch_operands = 0 : i64, tpu.core_type = #tpu.core_type<tc>, window_params = [{transform_indices = @transform_0, window_bounds = array<i64: 16, 128>}, {transform_indices = @transform_1, window_bounds = array<i64: 16, 128>}, {transform_indices = @transform_2, window_bounds = array<i64: 16, 128>}, {pipeline_mode = #tpu.pipeline_mode<synchronous>, transform_indices = @transform_3, window_bounds = array<i64: 128, 128>}, {pipeline_mode = #tpu.pipeline_mode<synchronous>, transform_indices = @transform_4, window_bounds = array<i64: 1, 128>}, {pipeline_mode = #tpu.pipeline_mode<synchronous>, transform_indices = @transform_5, window_bounds = array<i64: 1, 128>}, {transform_indices = @transform_6, window_bounds = array<i64: 16, 128>}]} {
    %c0 = arith.constant 0 : index
    %c0_0 = arith.constant 0 : index
    %0 = vector.load %arg4[%c0, %c0_0] : memref<128x128xf32, #tpu.memory_space<vmem>>, vector<128x128xf32>
    %c0_1 = arith.constant 0 : index
    %c0_2 = arith.constant 0 : index
    %1 = vector.load %arg5[%c0_1, %c0_2] : memref<1x128xf32, #tpu.memory_space<vmem>>, vector<1x128xf32>
    %c0_3 = arith.constant 0 : index
    %c0_4 = arith.constant 0 : index
    %2 = vector.load %arg6[%c0_3, %c0_4] : memref<1x128xf32, #tpu.memory_space<vmem>>, vector<1x128xf32>
    %c0_5 = arith.constant 0 : index
    %c0_6 = arith.constant 0 : index
    %3 = vector.load %arg1[%c0_5, %c0_6] : memref<16x128xf32, #tpu.memory_space<vmem>>, vector<16x128xf32>
    %c0_7 = arith.constant 0 : index
    %c0_8 = arith.constant 0 : index
    %4 = vector.load %arg2[%c0_7, %c0_8] : memref<16x128xf32, #tpu.memory_space<vmem>>, vector<16x128xf32>
    %c0_9 = arith.constant 0 : index
    %c0_10 = arith.constant 0 : index
    %5 = vector.load %arg3[%c0_9, %c0_10] : memref<16x128xf32, #tpu.memory_space<vmem>>, vector<16x128xf32>
    %cst = arith.constant dense<0.000000e+00> : vector<16x128xf32>
    %6 = tpu.matmul %3, %0, %cst {dimension_numbers = #tpu.dot_dimension_numbers<[1], [1], [0], [0], [0, 0, 1, 0], [], []>} : vector<16x128xf32>, vector<128x128xf32>, vector<16x128xf32> -> vector<16x128xf32>
    %7 = vector.broadcast %1 : vector<1x128xf32> to vector<16x128xf32>
    %8 = arith.addf %6, %7 : vector<16x128xf32>
    %cst_11 = arith.constant 0.000000e+00 : f32
    %9 = vector.broadcast %cst_11 : f32 to vector<16x128xf32>
    %10 = arith.maximumf %8, %9 : vector<16x128xf32>
    %11 = vector.broadcast %2 : vector<1x128xf32> to vector<16x128xf32>
    %12 = arith.mulf %10, %11 : vector<16x128xf32>
    %cst_12 = arith.constant dense<0.000000e+00> : vector<16xf32>
    %13 = vector.multi_reduction <add>, %12, %cst_12 [1] : vector<16x128xf32> to vector<16xf32>
    %14 = vector.shape_cast %13 : vector<16xf32> to vector<16x1xf32>
    %cst_13 = arith.constant dense<0.000000e+00> : vector<16x128xf32>
    %15 = tpu.matmul %4, %0, %cst_13 {dimension_numbers = #tpu.dot_dimension_numbers<[1], [1], [0], [0], [0, 0, 1, 0], [], []>} : vector<16x128xf32>, vector<128x128xf32>, vector<16x128xf32> -> vector<16x128xf32>
    %16 = vector.broadcast %1 : vector<1x128xf32> to vector<16x128xf32>
    %17 = arith.addf %15, %16 : vector<16x128xf32>
    %cst_14 = arith.constant 0.000000e+00 : f32
    %18 = vector.broadcast %cst_14 : f32 to vector<16x128xf32>
    %19 = arith.maximumf %17, %18 : vector<16x128xf32>
    %20 = vector.broadcast %2 : vector<1x128xf32> to vector<16x128xf32>
    %21 = arith.mulf %19, %20 : vector<16x128xf32>
    %cst_15 = arith.constant dense<0.000000e+00> : vector<16xf32>
    %22 = vector.multi_reduction <add>, %21, %cst_15 [1] : vector<16x128xf32> to vector<16xf32>
    %23 = vector.shape_cast %22 : vector<16xf32> to vector<16x1xf32>
    %cst_16 = arith.constant dense<0.000000e+00> : vector<16x128xf32>
    %24 = tpu.matmul %5, %0, %cst_16 {dimension_numbers = #tpu.dot_dimension_numbers<[1], [1], [0], [0], [0, 0, 1, 0], [], []>} : vector<16x128xf32>, vector<128x128xf32>, vector<16x128xf32> -> vector<16x128xf32>
    %25 = vector.broadcast %1 : vector<1x128xf32> to vector<16x128xf32>
    %26 = arith.addf %24, %25 : vector<16x128xf32>
    %cst_17 = arith.constant 0.000000e+00 : f32
    %27 = vector.broadcast %cst_17 : f32 to vector<16x128xf32>
    %28 = arith.maximumf %26, %27 : vector<16x128xf32>
    %29 = vector.broadcast %2 : vector<1x128xf32> to vector<16x128xf32>
    %30 = arith.mulf %28, %29 : vector<16x128xf32>
    %cst_18 = arith.constant dense<0.000000e+00> : vector<16xf32>
    %31 = vector.multi_reduction <add>, %30, %cst_18 [1] : vector<16x128xf32> to vector<16xf32>
    %32 = vector.shape_cast %31 : vector<16xf32> to vector<16x1xf32>
    %33 = arith.maximumf %14, %23 : vector<16x1xf32>
    %34 = arith.maximumf %33, %32 : vector<16x1xf32>
    %35 = arith.subf %14, %34 : vector<16x1xf32>
    %36 = math.exp %35 : vector<16x1xf32>
    %37 = arith.subf %23, %34 : vector<16x1xf32>
    %38 = math.exp %37 : vector<16x1xf32>
    %39 = arith.subf %32, %34 : vector<16x1xf32>
    %40 = math.exp %39 : vector<16x1xf32>
    %41 = arith.addf %36, %38 : vector<16x1xf32>
    %42 = arith.addf %41, %40 : vector<16x1xf32>
    %cst_19 = arith.constant 1.000000e+00 : f32
    %43 = vector.broadcast %cst_19 : f32 to vector<16x1xf32>
    %44 = arith.divf %43, %42 : vector<16x1xf32>
    %45 = vector.broadcast %36 : vector<16x1xf32> to vector<16x128xf32>
    %46 = arith.mulf %45, %3 : vector<16x128xf32>
    %47 = vector.broadcast %38 : vector<16x1xf32> to vector<16x128xf32>
    %48 = arith.mulf %47, %4 : vector<16x128xf32>
    %49 = arith.addf %46, %48 : vector<16x128xf32>
    %50 = vector.broadcast %40 : vector<16x1xf32> to vector<16x128xf32>
    %51 = arith.mulf %50, %5 : vector<16x128xf32>
    %52 = arith.addf %49, %51 : vector<16x128xf32>
    %53 = vector.broadcast %44 : vector<16x1xf32> to vector<16x128xf32>
    %54 = arith.mulf %52, %53 : vector<16x128xf32>
    %c0_20 = arith.constant 0 : index
    %c0_21 = arith.constant 0 : index
    %55 = vector.load %arg7[%c0_20, %c0_21] : memref<16x128xf32, #tpu.memory_space<vmem>>, vector<16x128xf32>
    tpu.vector_store %arg7[%c0_20, %c0_21], %54 {strides = array<i32>} : memref<16x128xf32, #tpu.memory_space<vmem>>, vector<16x128xf32>,
    return
  }
  func.func @transform_0(%arg0: i32) -> (i32, i32) {
    %c0_i32 = arith.constant 0 : i32
    %c0_i32_0 = arith.constant 0 : i32
    return %arg0, %c0_i32 : i32, i32
  }
  func.func @transform_1(%arg0: i32) -> (i32, i32) {
    %c0_i32 = arith.constant 0 : i32
    %c0_i32_0 = arith.constant 0 : i32
    return %arg0, %c0_i32 : i32, i32
  }
  func.func @transform_2(%arg0: i32) -> (i32, i32) {
    %c0_i32 = arith.constant 0 : i32
    %c0_i32_0 = arith.constant 0 : i32
    return %arg0, %c0_i32 : i32, i32
  }
  func.func @transform_3(%arg0: i32) -> (i32, i32) {
    %c0_i32 = arith.constant 0 : i32
    %c0_i32_0 = arith.constant 0 : i32
    %c0_i32_1 = arith.constant 0 : i32
    return %c0_i32, %c0_i32_0 : i32, i32
  }
  func.func @transform_4(%arg0: i32) -> (i32, i32) {
    %c0_i32 = arith.constant 0 : i32
    %c0_i32_0 = arith.constant 0 : i32
    %c0_i32_1 = arith.constant 0 : i32
    return %c0_i32, %c0_i32_0 : i32, i32
  }
  func.func @transform_5(%arg0: i32) -> (i32, i32) {
    %c0_i32 = arith.constant 0 : i32
    %c0_i32_0 = arith.constant 0 : i32
    %c0_i32_1 = arith.constant 0 : i32
    return %c0_i32, %c0_i32_0 : i32, i32
  }
  func.func @transform_6(%arg0: i32) -> (i32, i32) {
    %c0_i32 = arith.constant 0 : i32
    %c0_i32_0 = arith.constant 0 : i32
    return %arg0, %c0_i32 : i32, i32
  }
}

</mosaic_0001>

<bundles_post_ra>
// kernel: tpu_custom_call.1
= control target key start
LH: loop header
LB: loop body
LE: loop exit
PB: predicated region body
PF: predicated region fallthrough
CT: control target
= control target key end

     0   :  { %s1734_s0 = inlined_call_operand.hbm [shape: f32[64,128], index: 0, kind: input, shape index: {}]   ;;  %s1735_s1 = inlined_call_operand.hbm [shape: f32[64,128], index: 1, kind: input, shape index: {}]   ;;  %s1736_s2 = inlined_call_operand.hbm [shape: f32[64,128], index: 2, kind: input, shape index: {}]   ;;  %s1737_s3 = inlined_call_operand.hbm [shape: f32[128,128], index: 3, kind: input, shape index: {}]   ;;  %s1738_s4 = inlined_call_operand.vmem [shape: f32[1,128], index: 4, kind: input, shape index: {}]   ;;  %s1739_s5 = inlined_call_operand.vmem [shape: f32[1,128], index: 5, kind: input, shape index: {}]   ;;  %s1740_s6 = inlined_call_operand.hbm [shape: f32[64,128], index: 6, kind: output, shape index: {}]  }
   0x1   :  { %1756 = sst [smem:[#allocation19_spill]] %s1735_s1 }
   0x2   :  { %11 = vsyncpa [#allocation3], 0 }
   0x3   :  { %13 = vsyncpa [#allocation3 + $0x1], 0 }
   0x4   :  { %14 = vsyncpa [#allocation6], 0 }
   0x5   :  { %16 = vsyncpa [#allocation6 + $0x1], 0 }
   0x6   :  { %17 = vsyncpa [#allocation9], 0 }
   0x7   :  { %18 = vsyncpa [#allocation4], 0 }
   0x8   :  { %20 = vsyncpa [#allocation4 + $0x1], 0  ;;  %s1339_s21 = smov 0   ;;  %s1341_s22 = smov 0  }
   0x9   :  { %s1343_s23 = smov 0   ;;  %s1345_s24 = smov 0  }
   0xa LB: > { %1757 = sst [smem:[#allocation15_spill]] %s1289_s23  ;;  %s1360_s25 = sadd.s32 1, %s1293_s24   ;;  %s1293_s24 = sphi %s1345_s24, %s1781_s24   ;;  %s1289_s23 = sphi %s1343_s23, %s1783_s23   ;;  %s1285_s22 = sphi %s1341_s22, %s1785_s22   ;;  %s1281_s21 = sphi %s1339_s21, %s1784_s21  }
   0xb   : > { %1758 = sst [smem:[#allocation16_spill]] %s1360_s25  ;;  %s33_s26 = sadd.s32 1, %s1289_s23 }
   0xc   : > { %s30_s27 = ssub.s32 %s1293_s24, %s1360_s25  ;;  %p1741_p0 = scmp.ne.s32.totalorder %s1289_s23, %s1285_s22 }
   0xd   : > { %p31_p1 = scmp.eq.s32.totalorder %s30_s27, 0  ;;  %p41_p2 = scmp.eq.s32.totalorder %s1293_s24, 0 }
   0xe   : > { %p1055_p4 = scmp.lt.s32.totalorder %s1293_s24, 4  ;;  %s1746_s29 = sand.u32 1, %s1289_s23  }
   0xf   : > { %s1369_s28 = scalar_select %p31_p1, %s1289_s23, %s33_s26  }
  0x10   : > { %p42_p3 = por %p41_p2, %p1741_p0  ;;  %s1378_s30 = sshll.u32 %s1746_s29, 4 }
  0x11   : > { %1759 = sst [smem:[#allocation17_spill]] %s1369_s28  ;;  %s1381_s7 = sshll.u32 %s1293_s24, 8 }
  0x12   : > { %p1383_p5 = pnand %p1055_p4, %p42_p3  ;;  %s251_s9 = sand.u32 1, %s1293_s24  }
  0x13   : > { %s1761_s1 = sld [smem:[#allocation19_spill]]  ;;  %s255_s13 = scalar_lea.vmem [#allocation5], %s1378_s30 }
  0x14   : > { %s262_s14 = sshll.u32 %s255_s13, 4  ;;  %s1397_s15 = scalar_lea.sflag [#allocation6], %s251_s9  ;;  %s1395_s14 = int_to_ptr.vmem [resolvable:$true] %s262_s14 }
  0x15   : > { %p1403_p7 = pneg %p1383_p5 }
  0x19   : > { %s1392_s12 = scalar_lea.hbm %s1761_s1, %s1381_s7  ;;  %s1116_s20 = scalar_lea.hbm %s1761_s1, 1024 }
  0x1a   : > { %s1111_s16 = scalar_lea.hbm %s1392_s12, 256  ;;  %p1117_p10 = scmp.lt.s32.totalorder %s1392_s12, %s1761_s1 }
  0x1b   : > { %p1112_p6 = scmp.ne.s32.totalorder %s1392_s12, %s1111_s16  ;;  %p1118_p11 = scmp.lt.s32.totalorder %s1116_s20, %s1111_s16 }
  0x1d   : > { %p1114_p8 = pnand %p1403_p7, %p1112_p6  ;;  %p1119_p12 = por %p1118_p11, %p1117_p10 }
  0x1f   : > { %p1115_p9 = pneg %p1114_p8 }
  0x21   : > { %p1120_p13 = pnand %p1119_p12, %p1115_p9 }
  0x23   : > { %1123 = shalt.err (!%p1120_p13)
}
  0x24   : > { %s1124_s9 = scalar_lea.vmem %s1395_s14, 256  ;;  %s1295_s10 = smov [#allocation5]  }
  0x25   : > { %p1125_p1 = scmp.ne.s32.totalorder %s1395_s14, %s1124_s9  ;;  %s1129_s11 = sshll.u32 %s1295_s10, 4  ;;  %s1130_s11 = int_to_ptr.vmem [resolvable:$false] %s1129_s11 }
  0x26   : > { %s1131_s13 = scalar_lea.vmem %s1130_s11, 512  ;;  %p1132_p4 = scmp.lt.s32.totalorder %s1395_s14, %s1130_s11 }
  0x27   : > { %p1127_p2 = pnand %p1125_p1, %p1403_p7  ;;  %p1133_p6 = scmp.lt.s32.totalorder %s1131_s13, %s1124_s9 }
  0x29   : > { %p1128_p3 = pneg %p1127_p2  ;;  %p1134_p8 = por %p1133_p6, %p1132_p4 }
  0x2b   : > { %p1135_p0 = pnand %p1134_p8, %p1128_p3 }
  0x2d   : > { %1138 = shalt.err (!%p1135_p0)
}
  0x2e   : > { %s1742_s16 = smov 128   ;;  %s1744_s18 = smov 8  }
  0x2f   : > { %1046 = dma.hbm_to_vmem [thread:$0]  (!%p1383_p5), %s1392_s12, 256, %s1395_s14, %s1397_s15, %s1742_s16, %s1742_s16, %s1744_s18  }
  0x30   : > { %s1430_s19 = sadd.s32 4294967295, %s1293_s24   ;;  %s835_s20 = sadd.s32 4294967294, %s1293_s24  }
  0x31   : > { %p46_p0 = scmp.ne.s32.totalorder %s1285_s22, %s1281_s21  ;;  %p1750_p9 = scmp.eq.s32.totalorder %s1430_s19, 0 }
  0x32   : > { %p185_p10 = scmp.eq.s32.totalorder %s1430_s19, 3  ;;  %p191_p11 = scmp.eq.s32.totalorder %s835_s20, 3 }
  0x33   : > { %p1439_p12 = por %p1750_p9, %p46_p0  ;;  %p836_p13 = scmp.ge.s32.totalorder %s1293_s24, 1 }
  0x34   : > { %p1764_p1 = scmp.ne.s32.totalorder %s1289_s23, %s1285_s22  ;;  %p1451_p3 = por %p191_p11, %p46_p0 }
  0x35   : > { %s1763_s26 = scalar_select %p1439_p12, 1, 0 }
  0x36   : > { %p1447_p2 = por %p185_p10, %p1764_p1  ;;  %p198_p4 = scmp.lt.s32.totalorder %s1293_s24, 5 }
  0x37   : > { %s1766_s14 = scalar_select %p1451_p3, 1, 0 }
  0x38   : > { %s1765_s12 = scalar_select %p1447_p2, 1, 0 }
  0x39   : > { %1767 = sst [smem:[#allocation18_spill]] %s1766_s14  ;;  %p1456_p6 = pnand %p836_p13, %p198_p4 }
  0x3a   : > { %s1298_s9 = smov [#allocation8]   ;;  %s1468_s20 = scalar_lea.hbm %s1734_s0, %s1381_s7 }
  0x3b   : > { %s1768_s27 = scalar_select %p1456_p6, 1, 0 }
  0x3c   : > { %s210_s10 = sshll.u32 %s1298_s9, 4  ;;  %p1036_p8 = pneg %p1456_p6  ;;  %s1460_s10 = int_to_ptr.vmem [resolvable:$true] %s210_s10 }
  0x3d   : > { %s234_s16 = scalar_lea.vmem [#allocation2], %s1378_s30  ;;  %s1770_s9 = sand.u32 1, %s1289_s23  }
  0x3e   : > { %s241_s18 = sshll.u32 %s234_s16, 4  ;;  %p1473_p0 = pnand %p1036_p8, %p1750_p9  ;;  %s1477_s18 = int_to_ptr.vmem [resolvable:$true] %s241_s18 }
  0x3f   : > { %s231_s1 = scalar_lea.sflag [#allocation3], %s1770_s9  ;;  %s1139_s28 = scalar_lea.hbm %s1468_s20, 256 }
  0x40   : > { %s1769_s29 = scalar_select %p1473_p0, 1, 0 }
  0x41   : > { %p1140_p10 = scmp.ne.s32.totalorder %s1468_s20, %s1139_s28  ;;  %s1144_s25 = scalar_lea.hbm %s1734_s0, 1024 }
  0x42   : > { %p1145_p1 = scmp.lt.s32.totalorder %s1468_s20, %s1734_s0  ;;  %p1146_p4 = scmp.lt.s32.totalorder %s1144_s25, %s1139_s28 }
  0x43   : > { %p1142_p11 = pnand %p1140_p10, %p1403_p7 }
  0x44   : > { %p1147_p8 = por %p1146_p4, %p1145_p1 }
  0x45   : > { %p1143_p13 = pneg %p1142_p11 }
  0x47   : > { %p1148_p9 = pnand %p1147_p8, %p1143_p13 }
  0x49   : > { %1151 = shalt.err (!%p1148_p9)
}
  0x4a   : > { %s1152_s9 = scalar_lea.vmem %s1477_s18, 256  ;;  %s1299_s23 = smov [#allocation2]  }
  0x4b   : > { %p1153_p3 = scmp.ne.s32.totalorder %s1477_s18, %s1152_s9  ;;  %s1157_s11 = sshll.u32 %s1299_s23, 4  ;;  %s1158_s11 = int_to_ptr.vmem [resolvable:$false] %s1157_s11 }
  0x4c   : > { %s1159_s13 = scalar_lea.vmem %s1158_s11, 512  ;;  %p1160_p2 = scmp.lt.s32.totalorder %s1477_s18, %s1158_s11 }
  0x4d   : > { %p1155_p10 = pnand %p1153_p3, %p1403_p7  ;;  %p1161_p12 = scmp.lt.s32.totalorder %s1159_s13, %s1152_s9 }
  0x4f   : > { %p1156_p11 = pneg %p1155_p10  ;;  %p1162_p6 = por %p1161_p12, %p1160_p2 }
  0x51   : > { %p1163_p0 = pnand %p1162_p6, %p1156_p11 }
  0x53   : > { %1166 = shalt.err (!%p1163_p0)
}
  0x54   : > { %s1771_s25 = smov 8   ;;  %s1772_s28 = smov 128  }
  0x55   : > { %1043 = dma.hbm_to_vmem [thread:$0]  (!%p1383_p5), %s1468_s20, 256, %s1477_s18, %s231_s1, %s1772_s28, %s1772_s28, %s1771_s25  }
  0x56   : > { %s1508_s16 = scalar_lea.hbm %s1736_s2, %s1381_s7  ;;  %p1773_p9 = scmp.ne.s32.totalorder %s1769_s29, 0 }
  0x57   : > { %s1178_s9 = scalar_lea.vmem %s1460_s10, 2048  ;;  %p1186_p0 = scmp.lt.s32.totalorder %s1460_s10, %s1460_s10 }
  0x58   : > { %p1169_p12 = pneg %p1773_p9  ;;  %p1179_p2 = scmp.ne.s32.totalorder %s1460_s10, %s1178_s9 }
  0x59   : > { %p1187_p13 = scmp.lt.s32.totalorder %s1178_s9, %s1178_s9 }
  0x5a   : > { %p1181_p3 = pnand %p1179_p2, %p1169_p12 }
  0x5b   : > { %p1188_p1 = por %p1187_p13, %p1186_p0 }
  0x5c   : > { %p1182_p6 = pneg %p1181_p3 }
  0x5e   : > { %p1189_p4 = pnand %p1188_p1, %p1182_p6 }
  0x60   : > { %1192 = shalt.err (!%p1189_p4)
}
  0x61   : > { %1039 = dma.hbm_to_vmem [thread:$0]  (!%p1773_p9), %s1737_s3, 2048, %s1460_s10, [#allocation9], %s1772_s28, %s1772_s28, %s1771_s25  }
  0x62   : > { %s276_s18 = scalar_lea.vmem [#allocation7], %s1378_s30  ;;  %s1193_s11 = scalar_lea.hbm %s1508_s16, 256 }
  0x63   : > { %s283_s20 = sshll.u32 %s276_s18, 4  ;;  %p1194_p8 = scmp.ne.s32.totalorder %s1508_s16, %s1193_s11  ;;  %s284_s20 = int_to_ptr.vmem [resolvable:$true] %s283_s20 }
  0x64   : > { %s1198_s23 = scalar_lea.hbm %s1736_s2, 1024  ;;  %p1199_p12 = scmp.lt.s32.totalorder %s1508_s16, %s1736_s2 }
  0x65   : > { %p1196_p10 = pnand %p1194_p8, %p1403_p7  ;;  %p1200_p2 = scmp.lt.s32.totalorder %s1198_s23, %s1193_s11 }
  0x67   : > { %p1197_p11 = pneg %p1196_p10  ;;  %p1201_p3 = por %p1200_p2, %p1199_p12 }
  0x69   : > { %p1202_p6 = pnand %p1201_p3, %p1197_p11 }
  0x6b   : > { %1205 = shalt.err (!%p1202_p6)
}
  0x6c   : > { %s1206_s30 = scalar_lea.vmem %s284_s20, 256  ;;  %s1300_s10 = smov [#allocation7]  }
  0x6d   : > { %p1207_p9 = scmp.ne.s32.totalorder %s284_s20, %s1206_s30  ;;  %s1211_s1 = sshll.u32 %s1300_s10, 4  ;;  %s1212_s1 = int_to_ptr.vmem [resolvable:$false] %s1211_s1 }
  0x6e   : > { %s1213_s7 = scalar_lea.vmem %s1212_s1, 512  ;;  %p1214_p1 = scmp.lt.s32.totalorder %s284_s20, %s1212_s1 }
  0x6f   : > { %p1209_p0 = pnand %p1207_p9, %p1403_p7  ;;  %p1215_p4 = scmp.lt.s32.totalorder %s1213_s7, %s1206_s30 }
  0x71   : > { %p1210_p13 = pneg %p1209_p0  ;;  %p1216_p8 = por %p1215_p4, %p1214_p1 }
  0x73   : > { %p1217_p10 = pnand %p1216_p8, %p1210_p13 }
  0x75   : > { %1220 = shalt.err (!%p1217_p10)
}
  0x76   : > { %1049 = dma.hbm_to_vmem [thread:$0]  (!%p1383_p5), %s1508_s16, 256, %s284_s20, %s1397_s15, %s1772_s28, %s1772_s28, %s1771_s25  }
  0x77   : > { %p1774_p7 = scmp.ne.s32.totalorder %s1768_s27, 0 }
  0x78   : > { %s1549_s17 = sand.u32 (!%p1774_p7), 1, %s1285_s22   ;;  %p1775_p11 = scmp.ne.s32.totalorder (!%p1774_p7), %s1763_s26, 0 }
  0x79   : > { %295 = sbr.rel (%p1774_p7) target bundleno = 657 (0x291), region = 44  ;;  %s1552_s18 = sshll.u32 (!%p1774_p7), %s1549_s17, 4 }
  0x7a   : > { %s298_s11 = scalar_lea.sflag (!%p1774_p7), [#allocation3], %s1549_s17  ;;  %s301_s8 = scalar_lea.vmem (!%p1774_p7), [#allocation2], %s1552_s18 }
  0x7e   : > { %1264 = dma.done.wait (%p1775_p11), %s298_s11, 256  }
  0x7f   : > { %1266 = vsyncadd (%p1775_p11), %s298_s11, 4294967040  ;;  %s306_s15 = sand.u32 1, %s1430_s19   ;;  %s310_s25 = scalar_lea.vmem [#allocation5], %s1552_s18 }
  0x80   : > { %s307_s27 = scalar_lea.sflag [#allocation6], %s306_s15 }
  0x81   : > { %1268 = dma.done.wait (%p1775_p11), %s307_s27, 512  }
  0x82   : > { %1270 = vsyncadd (%p1775_p11), %s307_s27, 4294966784  ;;  %s319_s28 = scalar_lea.vmem [#allocation7], %s1552_s18  ;;  %p1776_p5 = scmp.eq.s32.totalorder %s1430_s19, 0 }
  0x84   : > { %1272 = dma.done.wait (%p1776_p5), [#allocation9], 2048   ;;  %p1777_p12 = pmov %p1776_p5 }
  0x85   : > { %v1571_v0 = vld [vmem:[#allocation8 + $0x78] sm:$0xff]  ;;  %v1573_v1 = vld [vmem:[#allocation8 + $0x70] sm:$0xff]  ;;  %v1581_v2 = vld [vmem:[#allocation8 + $0x68] sm:$0xff]  ;;  %s864_s13 = sshll.u32 %s1430_s19, 8  ;;  %s361_s23 = scalar_lea.vmem [#allocation10], %s1552_s18 }
  0x86   : > { %1274 = vsyncadd (%p1777_p12), [#allocation9], 4294965248  ;;  %919 = vmatprep.subr.mxu0 %v1571_v0  ;;  %954 = vmatprep.subr.mxu1 %v1571_v0  ;;  %v1585_v3 = vld [vmem:[%s301_s8] sm:$0xff]  ;;  %v1603_v6 = vld [vmem:[#allocation8 + $0x58] sm:$0xff]  ;;  %s709_s14 = sshll.u32 %s361_s23, 4  ;;  %s1690_s10 = scalar_lea.hbm %s1740_s6, %s864_s13  ;;  %s1692_s14 = int_to_ptr.vmem [resolvable:$true] %s709_s14 }
  0x87   : > { %920 = vmatpush3.xpose.msra.mxu0 %v1571_v0  ;;  %955 = vmatpush3.xpose.msra.mxu1 %v1571_v0  ;;  %v1589_v4 = vld [vmem:[%s310_s25] sm:$0xff]  ;;  %v1615_v8 = vld [vmem:[#allocation8 + $0x48] sm:$0xff]  ;;  %v1627_v10 = vld [vmem:[#allocation8 + $0x38] sm:$0xff]  ;;  %s696_s1 = scalar_lea.sflag [#allocation4], %s1549_s17  ;;  %s1221_s19 = scalar_lea.vmem %s1692_s14, 256 }
  0x88   : > { %921 = vmatprep.subr.mxu0 %v1573_v1  ;;  %956 = vmatprep.subr.mxu1 %v1573_v1  ;;  %v1595_v5 = vld [vmem:[#allocation8 + $0x60] sm:$0xff]  ;;  %v1609_v7 = vld [vmem:[#allocation8 + $0x50] sm:$0xff]  ;;  %v371_v12 = vld [vmem:[#allocation8 + $0x28] sm:$0xff]  ;;  %p1222_p2 = scmp.ne.s32.totalorder %s1692_s14, %s1221_s19  ;;  %p1778_p3 = scmp.ne.s32.totalorder %s1765_s12, 0 }
  0x89   : > { %951 = vmatprep.mubr.f32.mxu0 %v1585_v3  ;;  %986 = vmatprep.mubr.f32.mxu1 %v1589_v4  ;;  %v1621_v9 = vld [vmem:[#allocation8 + $0x40] sm:$0xff]  ;;  %v372_v11 = vld [vmem:[#allocation8 + $0x30] sm:$0xff]  ;;  %v369_v14 = vld [vmem:[#allocation8 + $0x18] sm:$0xff]  ;;  %s1301_s7 = smov [#allocation10]  }
  0x8a   : > { %v370_v13 = vld [vmem:[#allocation8 + $0x20] sm:$0xff]  ;;  %v368_v15 = vld [vmem:[#allocation8 + $0x10] sm:$0xff]  ;;  %v367_v16 = vld [vmem:[#allocation8 + $0x8] sm:$0xff]  ;;  %p1223_p6 = pnand %p1222_p2, %p1778_p3  ;;  %s1225_s18 = sshll.u32 %s1301_s7, 4  ;;  %s1226_s18 = int_to_ptr.vmem [resolvable:$false] %s1225_s18 }
  0x8b   : > { %922 = vmatpush3.xpose.msra.mxu0 %v1573_v1  ;;  %957 = vmatpush3.xpose.msra.mxu1 %v1573_v1  ;;  %v366_v17 = vld [vmem:[#allocation8] sm:$0xff]  ;;  %v1637_v18 = vld [vmem:[%s301_s8 + $0x8] sm:$0xff]  ;;  %s1227_s11 = scalar_lea.vmem %s1226_s18, 512  ;;  %p1228_p0 = scmp.lt.s32.totalorder %s1692_s14, %s1226_s18 }
  0x8c   : > { %923 = vmatprep.subr.mxu0 %v1581_v2  ;;  %958 = vmatprep.subr.mxu1 %v1581_v2  ;;  %v1641_v19 = vld [vmem:[%s310_s25 + $0x8] sm:$0xff]  ;;  %v1646_v20 = vld [vmem:[%s319_s28] sm:$0xff]  ;;  %p1224_p9 = pneg %p1223_p6  ;;  %p1229_p13 = scmp.lt.s32.totalorder %s1227_s11, %s1221_s19 }
  0x8d   : > { %v1670_v21 = vld [vmem:[%s319_s28 + $0x8] sm:$0xff]  ;;  %v854_v22 = vld [vmem:[%s1738_s4] ss:$0 sm:$0xff] }
  0x8e   : > { %v855_v29 = vld [vmem:[%s1739_s5] ss:$0 sm:$0xff]  ;;  %p1230_p1 = por %p1229_p13, %p1228_p0 }
  0x8f   : > { %924 = vmatpush3.xpose.msra.mxu0 %v1581_v2  ;;  %959 = vmatpush3.xpose.msra.mxu1 %v1581_v2 }
  0x90   : > { %925 = vmatprep.subr.mxu0 %v1595_v5  ;;  %960 = vmatprep.subr.mxu1 %v1595_v5  ;;  %p1231_p4 = pnand %p1230_p1, %p1224_p9 }
  0x93   : > { %926 = vmatpush3.xpose.msra.mxu0 %v1595_v5  ;;  %961 = vmatpush3.xpose.msra.mxu1 %v1595_v5 }
  0x94   : > { %927 = vmatprep.subr.mxu0 %v1603_v6  ;;  %962 = vmatprep.subr.mxu1 %v1603_v6 }
  0x97   : > { %928 = vmatpush3.xpose.msra.mxu0 %v1603_v6  ;;  %963 = vmatpush3.xpose.msra.mxu1 %v1603_v6 }
  0x98   : > { %929 = vmatprep.subr.mxu0 %v1609_v7  ;;  %964 = vmatprep.subr.mxu1 %v1609_v7 }
  0x9b   : > { %930 = vmatpush3.xpose.msra.mxu0 %v1609_v7  ;;  %965 = vmatpush3.xpose.msra.mxu1 %v1609_v7 }
  0x9c   : > { %931 = vmatprep.subr.mxu0 %v1615_v8  ;;  %966 = vmatprep.subr.mxu1 %v1615_v8 }
  0x9f   : > { %932 = vmatpush3.xpose.msra.mxu0 %v1615_v8  ;;  %967 = vmatpush3.xpose.msra.mxu1 %v1615_v8 }
  0xa0   : > { %933 = vmatprep.subr.mxu0 %v1621_v9  ;;  %968 = vmatprep.subr.mxu1 %v1621_v9 }
  0xa3   : > { %934 = vmatpush3.xpose.msra.mxu0 %v1621_v9  ;;  %969 = vmatpush3.xpose.msra.mxu1 %v1621_v9 }
  0xa4   : > { %935 = vmatprep.subr.mxu0 %v1627_v10  ;;  %970 = vmatprep.subr.mxu1 %v1627_v10 }
  0xa7   : > { %936 = vmatpush3.xpose.msra.mxu0 %v1627_v10  ;;  %971 = vmatpush3.xpose.msra.mxu1 %v1627_v10 }
  0xa8   : > { %937 = vmatprep.subr.mxu0 %v372_v11  ;;  %972 = vmatprep.subr.mxu1 %v372_v11 }
  0xab   : > { %938 = vmatpush3.xpose.msra.mxu0 %v372_v11  ;;  %973 = vmatpush3.xpose.msra.mxu1 %v372_v11 }
  0xac   : > { %939 = vmatprep.subr.mxu0 %v371_v12  ;;  %974 = vmatprep.subr.mxu1 %v371_v12 }
  0xaf   : > { %940 = vmatpush3.xpose.msra.mxu0 %v371_v12  ;;  %975 = vmatpush3.xpose.msra.mxu1 %v371_v12 }
  0xb0   : > { %941 = vmatprep.subr.mxu0 %v370_v13  ;;  %976 = vmatprep.subr.mxu1 %v370_v13 }
  0xb3   : > { %942 = vmatpush3.xpose.msra.mxu0 %v370_v13  ;;  %977 = vmatpush3.xpose.msra.mxu1 %v370_v13 }
  0xb4   : > { %943 = vmatprep.subr.mxu0 %v369_v14  ;;  %978 = vmatprep.subr.mxu1 %v369_v14 }
  0xb7   : > { %944 = vmatpush3.xpose.msra.mxu0 %v369_v14  ;;  %979 = vmatpush3.xpose.msra.mxu1 %v369_v14 }
  0xb8   : > { %945 = vmatprep.subr.mxu0 %v368_v15  ;;  %980 = vmatprep.subr.mxu1 %v368_v15 }
  0xbb   : > { %946 = vmatpush3.xpose.msra.mxu0 %v368_v15  ;;  %981 = vmatpush3.xpose.msra.mxu1 %v368_v15 }
  0xbc   : > { %947 = vmatprep.subr.mxu0 %v367_v16  ;;  %982 = vmatprep.subr.mxu1 %v367_v16 }
  0xbf   : > { %948 = vmatpush3.xpose.msra.mxu0 %v367_v16  ;;  %983 = vmatpush3.xpose.msra.mxu1 %v367_v16 }
  0xc0   : > { %949 = vmatprep.subr.mxu0 %v366_v17  ;;  %984 = vmatprep.subr.mxu1 %v366_v17 }
  0xc3   : > { %950 = vmatpush3.xpose.msra.mxu0 %v366_v17  ;;  %985 = vmatpush3.xpose.msra.mxu1 %v366_v17 }
  0xc4   : > { %989 = vmatprep.subr.mxu0 %v1571_v0 }
  0xc6   : > { %952 = vmatmul.mubr.f32.vlgmr.msra.gmra.mxu0 %v1637_v18  ;;  %987 = vmatmul.mubr.f32.vlgmr.msra.gmra.mxu1 %v1641_v19 }
  0xc7   : > { %990 = vmatpush3.xpose.msra.mxu0 %v1571_v0  ;;  %1021 = vmatprep.mubr.f32.mxu0 %v1646_v20 }
  0xc8   : > { %991 = vmatprep.subr.mxu0 %v1573_v1 }
  0xcb   : > { %992 = vmatpush3.xpose.msra.mxu0 %v1573_v1 }
  0xcc   : > { %993 = vmatprep.subr.mxu0 %v1581_v2 }
  0xcf   : > { %994 = vmatpush3.xpose.msra.mxu0 %v1581_v2 }
  0xd0   : > { %995 = vmatprep.subr.mxu0 %v1595_v5 }
  0xd3   : > { %996 = vmatpush3.xpose.msra.mxu0 %v1595_v5 }
  0xd4   : > { %997 = vmatprep.subr.mxu0 %v1603_v6 }
  0xd7   : > { %998 = vmatpush3.xpose.msra.mxu0 %v1603_v6 }
  0xd8   : > { %999 = vmatprep.subr.mxu0 %v1609_v7 }
  0xdb   : > { %1000 = vmatpush3.xpose.msra.mxu0 %v1609_v7 }
  0xdc   : > { %1001 = vmatprep.subr.mxu0 %v1615_v8 }
  0xdf   : > { %1002 = vmatpush3.xpose.msra.mxu0 %v1615_v8 }
  0xe0   : > { %1003 = vmatprep.subr.mxu0 %v1621_v9 }
  0xe3   : > { %1004 = vmatpush3.xpose.msra.mxu0 %v1621_v9 }
  0xe4   : > { %1005 = vmatprep.subr.mxu0 %v1627_v10 }
  0xe7   : > { %1006 = vmatpush3.xpose.msra.mxu0 %v1627_v10 }
  0xe8   : > { %1007 = vmatprep.subr.mxu0 %v372_v11 }
  0xeb   : > { %1008 = vmatpush3.xpose.msra.mxu0 %v372_v11 }
  0xec   : > { %1009 = vmatprep.subr.mxu0 %v371_v12 }
  0xef   : > { %1010 = vmatpush3.xpose.msra.mxu0 %v371_v12 }
  0xf0   : > { %1011 = vmatprep.subr.mxu0 %v370_v13 }
  0xf3   : > { %1012 = vmatpush3.xpose.msra.mxu0 %v370_v13 }
  0xf4   : > { %1013 = vmatprep.subr.mxu0 %v369_v14 }
  0xf7   : > { %1014 = vmatpush3.xpose.msra.mxu0 %v369_v14 }
  0xf8   : > { %1015 = vmatprep.subr.mxu0 %v368_v15 }
  0xfb   : > { %1016 = vmatpush3.xpose.msra.mxu0 %v368_v15 }
  0xfc   : > { %1017 = vmatprep.subr.mxu0 %v367_v16 }
  0xff   : > { %1018 = vmatpush3.xpose.msra.mxu0 %v367_v16 }
 0x100   : > { %1019 = vmatprep.subr.mxu0 %v366_v17 }
 0x103   : > { %1020 = vmatpush3.xpose.msra.mxu0 %v366_v17 }
 0x106   : > { %1022 = vmatmul.mubr.f32.vlgmr.msra.gmra.mxu0 %v1670_v21 }
 0x186   : > { %v953_v23 = vpop.f32.mrf.mxu0  ;;  %v988_v24 = vpop.f32.mrf.mxu1 }
 0x187   : > { %v468_v25 = vadd.f32 %v953_v23, %v854_v22  ;;  %v557_v26 = vadd.f32 %v988_v24, %v854_v22 }
 0x188   : > { %v462_v27 = vpop.f32.mrf.mxu0  ;;  %v551_v28 = vpop.f32.mrf.mxu1 }
 0x189   : > { %v472_v30 = vmax.f32 %v468_v25, 0.0  ;;  %v561_v31 = vmax.f32 %v557_v26, 0.0  ;;  %v463_v32 = vadd.f32 %v854_v22, %v462_v27  ;;  %v552_v33 = vadd.f32 %v854_v22, %v551_v28 }
 0x18b   : > { %v471_v34 = vmax.f32 %v463_v32, 0.0  ;;  %v560_v35 = vmax.f32 %v552_v33, 0.0  ;;  %v563_v36 = vmul.f32 %v855_v29, %v561_v31  ;;  %v480_v37 = vmul.f32 %v855_v29, %v472_v30 }
 0x18d   : > { %566 = vadd.xlane.f32.xlu1 %v563_v36  ;;  %483 = vadd.xlane.f32.xlu0 %v480_v37  ;;  %v562_v38 = vmul.f32 %v855_v29, %v560_v35  ;;  %v479_v39 = vmul.f32 %v855_v29, %v471_v34 }
 0x191   : > { %564 = vadd.xlane.f32.xlu1 %v562_v38  ;;  %481 = vadd.xlane.f32.xlu0 %v479_v39 }
 0x1c6   : > { %v1023_v40 = vpop.f32.mrf.mxu0 }
 0x1c7   : > { %v640_v41 = vadd.f32 %v1023_v40, %v854_v22 }
 0x1c8   : > { %v634_v42 = vpop.f32.mrf.mxu0 }
 0x1c9   : > { %v644_v43 = vmax.f32 %v640_v41, 0.0  ;;  %v635_v44 = vadd.f32 %v854_v22, %v634_v42 }
 0x1cb   : > { %v643_v45 = vmax.f32 %v635_v44, 0.0  ;;  %v646_v46 = vmul.f32 %v855_v29, %v644_v43 }
 0x1cd   : > { %649 = vadd.xlane.f32.xlu1 %v646_v46  ;;  %v645_v47 = vmul.f32 %v855_v29, %v643_v45 }
 0x1cf   : > { %647 = vadd.xlane.f32.xlu0 %v645_v47 }
 0x216   : > { %v567_v48 = vpop.xlane.xlu1 %566  ;;  %v484_v49 = vpop.xlane.xlu0 %483 }
 0x217   : > { %v652_v52 = vmax.f32 %v484_v49, %v567_v48 }
 0x21a   : > { %v565_v50 = vpop.xlane.xlu1 %564  ;;  %v482_v51 = vpop.xlane.xlu0 %481 }
 0x21b   : > { %v651_v54 = vmax.f32 %v482_v51, %v565_v50 }
 0x256   : > { %v650_v53 = vpop.xlane.xlu1 %649 }
 0x257   : > { %v654_v55 = vmax.f32 %v652_v52, %v650_v53 }
 0x258   : > { %v648_v56 = vpop.xlane.xlu0 %647 }
 0x259   : > { %v656_v57 = vsub.f32 %v484_v49, %v654_v55  ;;  %v662_v58 = vsub.f32 %v567_v48, %v654_v55  ;;  %v668_v59 = vsub.f32 %v650_v53, %v654_v55  ;;  %v653_v60 = vmax.f32 %v651_v54, %v648_v56 }
 0x25b   : > { %v659_v61 = vmul.f32 1.442695, %v656_v57  ;;  %v665_v62 = vmul.f32 1.442695, %v662_v58  ;;  %v671_v63 = vmul.f32 1.442695, %v668_v59  ;;  %v655_v0 = vsub.f32 %v482_v51, %v653_v60 }
 0x25c   : > { %v661_v1 = vsub.f32 %v565_v50, %v653_v60  ;;  %v667_v2 = vsub.f32 %v648_v56, %v653_v60 }
 0x25d   : > { %1095 = vpow2.f32 %v659_v61  ;;  %v657_v5 = vmul.f32 1.442695, %v655_v0 }
 0x25e   : > { %1097 = vpow2.f32 %v665_v62  ;;  %v663_v6 = vmul.f32 1.442695, %v661_v1  ;;  %v669_v7 = vmul.f32 1.442695, %v667_v2 }
 0x25f   : > { %1099 = vpow2.f32 %v671_v63 }
 0x260   : > { %1101 = vpow2.f32 %v657_v5 }
 0x261   : > { %1103 = vpow2.f32 %v663_v6 }
 0x262   : > { %1105 = vpow2.f32 %v669_v7 }
 0x26a   : > { %v1096_v8 = vpop.eup %1095 }
 0x26b   : > { %v1098_v9 = vpop.eup %1097  ;;  %v682_v22 = vmul.f32 %v1096_v8, %v1637_v18 }
 0x26c   : > { %v1100_v10 = vpop.eup %1099  ;;  %v674_v11 = vadd.f32 %v1098_v9, %v1096_v8  ;;  %v684_v23 = vmul.f32 %v1098_v9, %v1641_v19 }
 0x26d   : > { %v1102_v12 = vpop.eup %1101  ;;  %v688_v27 = vmul.f32 %v1100_v10, %v1670_v21 }
 0x26e   : > { %v1104_v13 = vpop.eup %1103  ;;  %v676_v14 = vadd.f32 %v1100_v10, %v674_v11  ;;  %v681_v24 = vmul.f32 %v1102_v12, %v1585_v3  ;;  %v686_v26 = vadd.f32 %v684_v23, %v682_v22 }
 0x26f   : > { %v673_v15 = vadd.f32 %v1104_v13, %v1102_v12  ;;  %v1106_v16 = vpop.eup %1105  ;;  %v683_v25 = vmul.f32 %v1104_v13, %v1589_v4 }
 0x270   : > { %1107 = vrcp.f32 %v676_v14  ;;  %v690_v29 = vadd.f32 %v688_v27, %v686_v26  ;;  %v687_v31 = vmul.f32 %v1106_v16, %v1646_v20 }
 0x271   : > { %v675_v17 = vadd.f32 %v1106_v16, %v673_v15  ;;  %v685_v28 = vadd.f32 %v683_v25, %v681_v24 }
 0x273   : > { %1109 = vrcp.f32 %v675_v17  ;;  %v689_v32 = vadd.f32 %v687_v31, %v685_v28 }
 0x27d   : > { %v1108_v30 = vpop.eup %1107 }
 0x27e   : > { %v692_v18 = vmul.f32 %v1108_v30, %v690_v29 }
 0x280   : > { %v1110_v19 = vpop.eup %1109  ;;  %694 = vst [vmem:[%s361_s23 + $0x8] sm:$0xff] %v692_v18 }
 0x281   : > { %v691_v3 = vmul.f32 %v1110_v19, %v689_v32 }
 0x283   : > { %693 = vst [vmem:[%s361_s23] sm:$0xff] %v691_v3 }
 0x284   : > { %1234 = shalt.err (!%p1231_p4)
}
 0x285   : > { %s1235_s8 = scalar_lea.hbm %s1690_s10, 256  ;;  %s1239_s25 = scalar_lea.hbm %s1740_s6, 1024 }
 0x286   : > { %p1236_p8 = scmp.ne.s32.totalorder %s1690_s10, %s1235_s8  ;;  %p1240_p11 = scmp.lt.s32.totalorder %s1690_s10, %s1740_s6 }
 0x287   : > { %p1241_p5 = scmp.lt.s32.totalorder %s1239_s25, %s1235_s8 }
 0x288   : > { %p1237_p10 = pnand %p1236_p8, %p1778_p3 }
 0x289   : > { %p1242_p12 = por %p1241_p5, %p1240_p11 }
 0x28a   : > { %p1238_p7 = pneg %p1237_p10 }
 0x28c   : > { %p1243_p2 = pnand %p1242_p12, %p1238_p7 }
 0x28e   : > { %1246 = shalt.err (!%p1243_p2)
}
 0x28f   : > { %s1302_s16 = smov 128   ;;  %s1303_s20 = smov 8  }
 0x290   : > { %1034 = dma.vmem_to_hbm [thread:$0]  (%p1778_p3), %s1692_s14, 256, %s1690_s10, %s696_s1, %s1302_s16, %s1302_s16, %s1303_s20  }
 0x291 PF: > { %s1779_s29 = sld [smem:[#allocation18_spill]]  ;;  %p1057_p6 = scmp.ge.s32.totalorder %s1293_s24, 2 }
 0x292   : > { %s724_s13 = sand.u32 1, %s1281_s21  }
 0x293   : > { %s725_s23 = scalar_lea.sflag [#allocation4], %s724_s13 }
 0x297   : > { %p1780_p9 = scmp.ne.s32.totalorder %s1779_s29, 0 }
 0x299   : > { %p1051_p0 = pnand %p1057_p6, %p1780_p9 }
 0x29b   : > { %p1052_p13 = pneg %p1051_p0 }
 0x29d   : > { %1276 = dma.done.wait (%p1052_p13), %s725_s23, 256  }
 0x29e   : > { %1278 = vsyncadd (%p1052_p13), %s725_s23, 4294967040  ;;  %s1781_s24 = sld [smem:[#allocation16_spill]]  ;;  %s1784_s21 = smov %s1285_s22 }
 0x29f   : > { %s1782_s9 = sld [smem:[#allocation15_spill]] }
 0x2a0   : > { %s1783_s23 = sld [smem:[#allocation17_spill]] }
 0x2a4   : > { %p23_p1 = scmp.ge.s32.totalorder %s1781_s24, 6  }
 0x2a5   : > { %s1785_s22 = smov %s1782_s9 }
 0x2a6   :  { %25 = sbr.rel (!%p23_p1) target bundleno = 10 (0xa), region = 117 }
 0x2ab   :  { %730 = vsyncpa [#allocation3], 1 }
 0x2ac   :  { %732 = vsyncpa [#allocation3 + $0x1], 1 }
 0x2ad   :  { %733 = vsyncpa [#allocation6], 1 }
 0x2ae   :  { %735 = vsyncpa [#allocation6 + $0x1], 1 }
 0x2af   :  { %736 = vsyncpa [#allocation9], 1 }
 0x2b0   :  { %737 = vsyncpa [#allocation4], 1 }
 0x2b1   :  { %739 = vsyncpa [#allocation4 + $0x1], 1 }

// kernel: tpu_custom_call.1
= control target key start
LH: loop header
LB: loop body
LE: loop exit
PB: predicated region body
PF: predicated region fallthrough
CT: control target
= control target key end

     0   :  { %s1734_s0 = inlined_call_operand.hbm [shape: f32[64,128], index: 0, kind: input, shape index: {}]   ;;  %s1735_s1 = inlined_call_operand.hbm [shape: f32[64,128], index: 1, kind: input, shape index: {}]   ;;  %s1736_s2 = inlined_call_operand.hbm [shape: f32[64,128], index: 2, kind: input, shape index: {}]   ;;  %s1737_s3 = inlined_call_operand.hbm [shape: f32[128,128], index: 3, kind: input, shape index: {}]   ;;  %s1738_s4 = inlined_call_operand.vmem [shape: f32[1,128], index: 4, kind: input, shape index: {}]   ;;  %s1739_s5 = inlined_call_operand.vmem [shape: f32[1,128], index: 5, kind: input, shape index: {}]   ;;  %s1740_s6 = inlined_call_operand.hbm [shape: f32[64,128], index: 6, kind: output, shape index: {}]  }
   0x1   :  { %1756 = sst [smem:[#allocation19_spill]] %s1735_s1 }
   0x2   :  { %11 = vsyncpa [#allocation3], 0 }
   0x3   :  { %13 = vsyncpa [#allocation3 + $0x1], 0 }
   0x4   :  { %14 = vsyncpa [#allocation6], 0 }
   0x5   :  { %16 = vsyncpa [#allocation6 + $0x1], 0 }
   0x6   :  { %17 = vsyncpa [#allocation9], 0 }
   0x7   :  { %18 = vsyncpa [#allocation4], 0 }
   0x8   :  { %20 = vsyncpa [#allocation4 + $0x1], 0  ;;  %s1339_s21 = smov 0   ;;  %s1341_s22 = smov 0  }
   0x9   :  { %s1343_s23 = smov 0   ;;  %s1345_s24 = smov 0  }
   0xa LB: > { %1757 = sst [smem:[#allocation15_spill]] %s1289_s23  ;;  %s1360_s25 = sadd.s32 1, %s1293_s24   ;;  %s1293_s24 = sphi %s1345_s24, %s1781_s24   ;;  %s1289_s23 = sphi %s1343_s23, %s1783_s23   ;;  %s1285_s22 = sphi %s1341_s22, %s1785_s22   ;;  %s1281_s21 = sphi %s1339_s21, %s1784_s21  }
   0xb   : > { %1758 = sst [smem:[#allocation16_spill]] %s1360_s25  ;;  %s33_s26 = sadd.s32 1, %s1289_s23 }
   0xc   : > { %s30_s27 = ssub.s32 %s1293_s24, %s1360_s25  ;;  %p1741_p0 = scmp.ne.s32.totalorder %s1289_s23, %s1285_s22 }
   0xd   : > { %p31_p1 = scmp.eq.s32.totalorder %s30_s27, 0  ;;  %p41_p2 = scmp.eq.s32.totalorder %s1293_s24, 0 }
   0xe   : > { %p1055_p4 = scmp.lt.s32.totalorder %s1293_s24, 4  ;;  %s1746_s29 = sand.u32 1, %s1289_s23  }
   0xf   : > { %s1369_s28 = scalar_select %p31_p1, %s1289_s23, %s33_s26  }
  0x10   : > { %p42_p3 = por %p41_p2, %p1741_p0  ;;  %s1378_s30 = sshll.u32 %s1746_s29, 4 }
  0x11   : > { %1759 = sst [smem:[#allocation17_spill]] %s1369_s28  ;;  %s1381_s7 = sshll.u32 %s1293_s24, 8 }
  0x12   : > { %p1383_p5 = pnand %p1055_p4, %p42_p3  ;;  %s251_s9 = sand.u32 1, %s1293_s24  }
  0x13   : > { %s1761_s1 = sld [smem:[#allocation19_spill]]  ;;  %s255_s13 = scalar_lea.vmem [#allocation5], %s1378_s30 }
  0x14   : > { %s262_s14 = sshll.u32 %s255_s13, 4  ;;  %s1397_s15 = scalar_lea.sflag [#allocation6], %s251_s9  ;;  %s1395_s14 = int_to_ptr.vmem [resolvable:$true] %s262_s14 }
  0x15   : > { %p1403_p7 = pneg %p1383_p5 }
  0x19   : > { %s1392_s12 = scalar_lea.hbm %s1761_s1, %s1381_s7  ;;  %s1116_s20 = scalar_lea.hbm %s1761_s1, 1024 }
  0x1a   : > { %s1111_s16 = scalar_lea.hbm %s1392_s12, 256  ;;  %p1117_p10 = scmp.lt.s32.totalorder %s1392_s12, %s1761_s1 }
  0x1b   : > { %p1112_p6 = scmp.ne.s32.totalorder %s1392_s12, %s1111_s16  ;;  %p1118_p11 = scmp.lt.s32.totalorder %s1116_s20, %s1111_s16 }
  0x1d   : > { %p1114_p8 = pnand %p1403_p7, %p1112_p6  ;;  %p1119_p12 = por %p1118_p11, %p1117_p10 }
  0x1f   : > { %p1115_p9 = pneg %p1114_p8 }
  0x21   : > { %p1120_p13 = pnand %p1119_p12, %p1115_p9 }
  0x23   : > { %1123 = shalt.err (!%p1120_p13)
}
  0x24   : > { %s1124_s9 = scalar_lea.vmem %s1395_s14, 256  ;;  %s1295_s10 = smov [#allocation5]  }
  0x25   : > { %p1125_p1 = scmp.ne.s32.totalorder %s1395_s14, %s1124_s9  ;;  %s1129_s11 = sshll.u32 %s1295_s10, 4  ;;  %s1130_s11 = int_to_ptr.vmem [resolvable:$false] %s1129_s11 }
  0x26   : > { %s1131_s13 = scalar_lea.vmem %s1130_s11, 512  ;;  %p1132_p4 = scmp.lt.s32.totalorder %s1395_s14, %s1130_s11 }
  0x27   : > { %p1127_p2 = pnand %p1125_p1, %p1403_p7  ;;  %p1133_p6 = scmp.lt.s32.totalorder %s1131_s13, %s1124_s9 }
  0x29   : > { %p1128_p3 = pneg %p1127_p2  ;;  %p1134_p8 = por %p1133_p6, %p1132_p4 }
  0x2b   : > { %p1135_p0 = pnand %p1134_p8, %p1128_p3 }
  0x2d   : > { %1138 = shalt.err (!%p1135_p0)
}
  0x2e   : > { %s1742_s16 = smov 128   ;;  %s1744_s18 = smov 8  }
  0x2f   : > { %1046 = dma.hbm_to_vmem [thread:$0]  (!%p1383_p5), %s1392_s12, 256, %s1395_s14, %s1397_s15, %s1742_s16, %s1742_s16, %s1744_s18  }
  0x30   : > { %s1430_s19 = sadd.s32 4294967295, %s1293_s24   ;;  %s835_s20 = sadd.s32 4294967294, %s1293_s24  }
  0x31   : > { %p46_p0 = scmp.ne.s32.totalorder %s1285_s22, %s1281_s21  ;;  %p1750_p9 = scmp.eq.s32.totalorder %s1430_s19, 0 }
  0x32   : > { %p185_p10 = scmp.eq.s32.totalorder %s1430_s19, 3  ;;  %p191_p11 = scmp.eq.s32.totalorder %s835_s20, 3 }
  0x33   : > { %p1439_p12 = por %p1750_p9, %p46_p0  ;;  %p836_p13 = scmp.ge.s32.totalorder %s1293_s24, 1 }
  0x34   : > { %p1764_p1 = scmp.ne.s32.totalorder %s1289_s23, %s1285_s22  ;;  %p1451_p3 = por %p191_p11, %p46_p0 }
  0x35   : > { %s1763_s26 = scalar_select %p1439_p12, 1, 0 }
  0x36   : > { %p1447_p2 = por %p185_p10, %p1764_p1  ;;  %p198_p4 = scmp.lt.s32.totalorder %s1293_s24, 5 }
  0x37   : > { %s1766_s14 = scalar_select %p1451_p3, 1, 0 }
  0x38   : > { %s1765_s12 = scalar_select %p1447_p2, 1, 0 }
  0x39   : > { %1767 = sst [smem:[#allocation18_spill]] %s1766_s14  ;;  %p1456_p6 = pnand %p836_p13, %p198_p4 }
  0x3a   : > { %s1298_s9 = smov [#allocation8]   ;;  %s1468_s20 = scalar_lea.hbm %s1734_s0, %s1381_s7 }
  0x3b   : > { %s1768_s27 = scalar_select %p1456_p6, 1, 0 }
  0x3c   : > { %s210_s10 = sshll.u32 %s1298_s9, 4  ;;  %p1036_p8 = pneg %p1456_p6  ;;  %s1460_s10 = int_to_ptr.vmem [resolvable:$true] %s210_s10 }
  0x3d   : > { %s234_s16 = scalar_lea.vmem [#allocation2], %s1378_s30  ;;  %s1770_s9 = sand.u32 1, %s1289_s23  }
  0x3e   : > { %s241_s18 = sshll.u32 %s234_s16, 4  ;;  %p1473_p0 = pnand %p1036_p8, %p1750_p9  ;;  %s1477_s18 = int_to_ptr.vmem [resolvable:$true] %s241_s18 }
  0x3f   : > { %s231_s1 = scalar_lea.sflag [#allocation3], %s1770_s9  ;;  %s1139_s28 = scalar_lea.hbm %s1468_s20, 256 }
  0x40   : > { %s1769_s29 = scalar_select %p1473_p0, 1, 0 }
  0x41   : > { %p1140_p10 = scmp.ne.s32.totalorder %s1468_s20, %s1139_s28  ;;  %s1144_s25 = scalar_lea.hbm %s1734_s0, 1024 }
  0x42   : > { %p1145_p1 = scmp.lt.s32.totalorder %s1468_s20, %s1734_s0  ;;  %p1146_p4 = scmp.lt.s32.totalorder %s1144_s25, %s1139_s28 }
  0x43   : > { %p1142_p11 = pnand %p1140_p10, %p1403_p7 }
  0x44   : > { %p1147_p8 = por %p1146_p4, %p1145_p1 }
  0x45   : > { %p1143_p13 = pneg %p1142_p11 }
  0x47   : > { %p1148_p9 = pnand %p1147_p8, %p1143_p13 }
  0x49   : > { %1151 = shalt.err (!%p1148_p9)
}
  0x4a   : > { %s1152_s9 = scalar_lea.vmem %s1477_s18, 256  ;;  %s1299_s23 = smov [#allocation2]  }
  0x4b   : > { %p1153_p3 = scmp.ne.s32.totalorder %s1477_s18, %s1152_s9  ;;  %s1157_s11 = sshll.u32 %s1299_s23, 4  ;;  %s1158_s11 = int_to_ptr.vmem [resolvable:$false] %s1157_s11 }
  0x4c   : > { %s1159_s13 = scalar_lea.vmem %s1158_s11, 512  ;;  %p1160_p2 = scmp.lt.s32.totalorder %s1477_s18, %s1158_s11 }
  0x4d   : > { %p1155_p10 = pnand %p1153_p3, %p1403_p7  ;;  %p1161_p12 = scmp.lt.s32.totalorder %s1159_s13, %s1152_s9 }
  0x4f   : > { %p1156_p11 = pneg %p1155_p10  ;;  %p1162_p6 = por %p1161_p12, %p1160_p2 }
  0x51   : > { %p1163_p0 = pnand %p1162_p6, %p1156_p11 }
  0x53   : > { %1166 = shalt.err (!%p1163_p0)
}
  0x54   : > { %s1771_s25 = smov 8   ;;  %s1772_s28 = smov 128  }
  0x55   : > { %1043 = dma.hbm_to_vmem [thread:$0]  (!%p1383_p5), %s1468_s20, 256, %s1477_s18, %s231_s1, %s1772_s28, %s1772_s28, %s1771_s25  }
  0x56   : > { %s1508_s16 = scalar_lea.hbm %s1736_s2, %s1381_s7  ;;  %p1773_p9 = scmp.ne.s32.totalorder %s1769_s29, 0 }
  0x57   : > { %s1178_s9 = scalar_lea.vmem %s1460_s10, 2048  ;;  %p1186_p0 = scmp.lt.s32.totalorder %s1460_s10, %s1460_s10 }
  0x58   : > { %p1169_p12 = pneg %p1773_p9  ;;  %p1179_p2 = scmp.ne.s32.totalorder %s1460_s10, %s1178_s9 }
  0x59   : > { %p1187_p13 = scmp.lt.s32.totalorder %s1178_s9, %s1178_s9 }
  0x5a   : > { %p1181_p3 = pnand %p1179_p2, %p1169_p12 }
  0x5b   : > { %p1188_p1 = por %p1187_p13, %p1186_p0 }
  0x5c   : > { %p1182_p6 = pneg %p1181_p3 }
  0x5e   : > { %p1189_p4 = pnand %p1188_p1, %p1182_p6 }
  0x60   : > { %1192 = shalt.err (!%p1189_p4)
}
  0x61   : > { %1039 = dma.hbm_to_vmem [thread:$0]  (!%p1773_p9), %s1737_s3, 2048, %s1460_s10, [#allocation9], %s1772_s28, %s1772_s28, %s1771_s25  }
  0x62   : > { %s276_s18 = scalar_lea.vmem [#allocation7], %s1378_s30  ;;  %s1193_s11 = scalar_lea.hbm %s1508_s16, 256 }
  0x63   : > { %s283_s20 = sshll.u32 %s276_s18, 4  ;;  %p1194_p8 = scmp.ne.s32.totalorder %s1508_s16, %s1193_s11  ;;  %s284_s20 = int_to_ptr.vmem [resolvable:$true] %s283_s20 }
  0x64   : > { %s1198_s23 = scalar_lea.hbm %s1736_s2, 1024  ;;  %p1199_p12 = scmp.lt.s32.totalorder %s1508_s16, %s1736_s2 }
  0x65   : > { %p1196_p10 = pnand %p1194_p8, %p1403_p7  ;;  %p1200_p2 = scmp.lt.s32.totalorder %s1198_s23, %s1193_s11 }
  0x67   : > { %p1197_p11 = pneg %p1196_p10  ;;  %p1201_p3 = por %p1200_p2, %p1199_p12 }
  0x69   : > { %p1202_p6 = pnand %p1201_p3, %p1197_p11 }
  0x6b   : > { %1205 = shalt.err (!%p1202_p6)
}
  0x6c   : > { %s1206_s30 = scalar_lea.vmem %s284_s20, 256  ;;  %s1300_s10 = smov [#allocation7]  }
  0x6d   : > { %p1207_p9 = scmp.ne.s32.totalorder %s284_s20, %s1206_s30  ;;  %s1211_s1 = sshll.u32 %s1300_s10, 4  ;;  %s1212_s1 = int_to_ptr.vmem [resolvable:$false] %s1211_s1 }
  0x6e   : > { %s1213_s7 = scalar_lea.vmem %s1212_s1, 512  ;;  %p1214_p1 = scmp.lt.s32.totalorder %s284_s20, %s1212_s1 }
  0x6f   : > { %p1209_p0 = pnand %p1207_p9, %p1403_p7  ;;  %p1215_p4 = scmp.lt.s32.totalorder %s1213_s7, %s1206_s30 }
  0x71   : > { %p1210_p13 = pneg %p1209_p0  ;;  %p1216_p8 = por %p1215_p4, %p1214_p1 }
  0x73   : > { %p1217_p10 = pnand %p1216_p8, %p1210_p13 }
  0x75   : > { %1220 = shalt.err (!%p1217_p10)
}
  0x76   : > { %1049 = dma.hbm_to_vmem [thread:$0]  (!%p1383_p5), %s1508_s16, 256, %s284_s20, %s1397_s15, %s1772_s28, %s1772_s28, %s1771_s25  }
  0x77   : > { %p1774_p7 = scmp.ne.s32.totalorder %s1768_s27, 0 }
  0x78   : > { %s1549_s17 = sand.u32 (!%p1774_p7), 1, %s1285_s22   ;;  %p1775_p11 = scmp.ne.s32.totalorder (!%p1774_p7), %s1763_s26, 0 }
  0x79   : > { %295 = sbr.rel (%p1774_p7) target bundleno = 657 (0x291), region = 44  ;;  %s1552_s18 = sshll.u32 (!%p1774_p7), %s1549_s17, 4 }
  0x7a   : > { %s298_s11 = scalar_lea.sflag (!%p1774_p7), [#allocation3], %s1549_s17  ;;  %s301_s8 = scalar_lea.vmem (!%p1774_p7), [#allocation2], %s1552_s18 }
  0x7e   : > { %1264 = dma.done.wait (%p1775_p11), %s298_s11, 256  }
  0x7f   : > { %1266 = vsyncadd (%p1775_p11), %s298_s11, 4294967040  ;;  %s306_s15 = sand.u32 1, %s1430_s19   ;;  %s310_s25 = scalar_lea.vmem [#allocation5], %s1552_s18 }
  0x80   : > { %s307_s27 = scalar_lea.sflag [#allocation6], %s306_s15 }
  0x81   : > { %1268 = dma.done.wait (%p1775_p11), %s307_s27, 512  }
  0x82   : > { %1270 = vsyncadd (%p1775_p11), %s307_s27, 4294966784  ;;  %s319_s28 = scalar_lea.vmem [#allocation7], %s1552_s18  ;;  %p1776_p5 = scmp.eq.s32.totalorder %s1430_s19, 0 }
  0x84   : > { %1272 = dma.done.wait (%p1776_p5), [#allocation9], 2048   ;;  %p1777_p12 = pmov %p1776_p5 }
  0x85   : > { %v1571_v0 = vld [vmem:[#allocation8 + $0x78] sm:$0xff]  ;;  %v1573_v1 = vld [vmem:[#allocation8 + $0x70] sm:$0xff]  ;;  %v1581_v2 = vld [vmem:[#allocation8 + $0x68] sm:$0xff]  ;;  %s864_s13 = sshll.u32 %s1430_s19, 8  ;;  %s361_s23 = scalar_lea.vmem [#allocation10], %s1552_s18 }
  0x86   : > { %1274 = vsyncadd (%p1777_p12), [#allocation9], 4294965248  ;;  %919 = vmatprep.subr.mxu0 %v1571_v0  ;;  %954 = vmatprep.subr.mxu1 %v1571_v0  ;;  %v1585_v3 = vld [vmem:[%s301_s8] sm:$0xff]  ;;  %v1603_v6 = vld [vmem:[#allocation8 + $0x58] sm:$0xff]  ;;  %s709_s14 = sshll.u32 %s361_s23, 4  ;;  %s1690_s10 = scalar_lea.hbm %s1740_s6, %s864_s13  ;;  %s1692_s14 = int_to_ptr.vmem [resolvable:$true] %s709_s14 }
  0x87   : > { %920 = vmatpush3.xpose.msra.mxu0 %v1571_v0  ;;  %955 = vmatpush3.xpose.msra.mxu1 %v1571_v0  ;;  %v1589_v4 = vld [vmem:[%s310_s25] sm:$0xff]  ;;  %v1615_v8 = vld [vmem:[#allocation8 + $0x48] sm:$0xff]  ;;  %v1627_v10 = vld [vmem:[#allocation8 + $0x38] sm:$0xff]  ;;  %s696_s1 = scalar_lea.sflag [#allocation4], %s1549_s17  ;;  %s1221_s19 = scalar_lea.vmem %s1692_s14, 256 }
  0x88   : > { %921 = vmatprep.subr.mxu0 %v1573_v1  ;;  %956 = vmatprep.subr.mxu1 %v1573_v1  ;;  %v1595_v5 = vld [vmem:[#allocation8 + $0x60] sm:$0xff]  ;;  %v1609_v7 = vld [vmem:[#allocation8 + $0x50] sm:$0xff]  ;;  %v371_v12 = vld [vmem:[#allocation8 + $0x28] sm:$0xff]  ;;  %p1222_p2 = scmp.ne.s32.totalorder %s1692_s14, %s1221_s19  ;;  %p1778_p3 = scmp.ne.s32.totalorder %s1765_s12, 0 }
  0x89   : > { %951 = vmatprep.mubr.f32.mxu0 %v1585_v3  ;;  %986 = vmatprep.mubr.f32.mxu1 %v1589_v4  ;;  %v1621_v9 = vld [vmem:[#allocation8 + $0x40] sm:$0xff]  ;;  %v372_v11 = vld [vmem:[#allocation8 + $0x30] sm:$0xff]  ;;  %v369_v14 = vld [vmem:[#allocation8 + $0x18] sm:$0xff]  ;;  %s1301_s7 = smov [#allocation10]  }
  0x8a   : > { %v370_v13 = vld [vmem:[#allocation8 + $0x20] sm:$0xff]  ;;  %v368_v15 = vld [vmem:[#allocation8 + $0x10] sm:$0xff]  ;;  %v367_v16 = vld [vmem:[#allocation8 + $0x8] sm:$0xff]  ;;  %p1223_p6 = pnand %p1222_p2, %p1778_p3  ;;  %s1225_s18 = sshll.u32 %s1301_s7, 4  ;;  %s1226_s18 = int_to_ptr.vmem [resolvable:$false] %s1225_s18 }
  0x8b   : > { %922 = vmatpush3.xpose.msra.mxu0 %v1573_v1  ;;  %957 = vmatpush3.xpose.msra.mxu1 %v1573_v1  ;;  %v366_v17 = vld [vmem:[#allocation8] sm:$0xff]  ;;  %v1637_v18 = vld [vmem:[%s301_s8 + $0x8] sm:$0xff]  ;;  %s1227_s11 = scalar_lea.vmem %s1226_s18, 512  ;;  %p1228_p0 = scmp.lt.s32.totalorder %s1692_s14, %s1226_s18 }
  0x8c   : > { %923 = vmatprep.subr.mxu0 %v1581_v2  ;;  %958 = vmatprep.subr.mxu1 %v1581_v2  ;;  %v1641_v19 = vld [vmem:[%s310_s25 + $0x8] sm:$0xff]  ;;  %v1646_v20 = vld [vmem:[%s319_s28] sm:$0xff]  ;;  %p1224_p9 = pneg %p1223_p6  ;;  %p1229_p13 = scmp.lt.s32.totalorder %s1227_s11, %s1221_s19 }
  0x8d   : > { %v1670_v21 = vld [vmem:[%s319_s28 + $0x8] sm:$0xff]  ;;  %v854_v22 = vld [vmem:[%s1738_s4] ss:$0 sm:$0xff] }
  0x8e   : > { %v855_v29 = vld [vmem:[%s1739_s5] ss:$0 sm:$0xff]  ;;  %p1230_p1 = por %p1229_p13, %p1228_p0 }
  0x8f   : > { %924 = vmatpush3.xpose.msra.mxu0 %v1581_v2  ;;  %959 = vmatpush3.xpose.msra.mxu1 %v1581_v2 }
  0x90   : > { %925 = vmatprep.subr.mxu0 %v1595_v5  ;;  %960 = vmatprep.subr.mxu1 %v1595_v5  ;;  %p1231_p4 = pnand %p1230_p1, %p1224_p9 }
  0x93   : > { %926 = vmatpush3.xpose.msra.mxu0 %v1595_v5  ;;  %961 = vmatpush3.xpose.msra.mxu1 %v1595_v5 }
  0x94   : > { %927 = vmatprep.subr.mxu0 %v1603_v6  ;;  %962 = vmatprep.subr.mxu1 %v1603_v6 }
  0x97   : > { %928 = vmatpush3.xpose.msra.mxu0 %v1603_v6  ;;  %963 = vmatpush3.xpose.msra.mxu1 %v1603_v6 }
  0x98   : > { %929 = vmatprep.subr.mxu0 %v1609_v7  ;;  %964 = vmatprep.subr.mxu1 %v1609_v7 }
  0x9b   : > { %930 = vmatpush3.xpose.msra.mxu0 %v1609_v7  ;;  %965 = vmatpush3.xpose.msra.mxu1 %v1609_v7 }
  0x9c   : > { %931 = vmatprep.subr.mxu0 %v1615_v8  ;;  %966 = vmatprep.subr.mxu1 %v1615_v8 }
  0x9f   : > { %932 = vmatpush3.xpose.msra.mxu0 %v1615_v8  ;;  %967 = vmatpush3.xpose.msra.mxu1 %v1615_v8 }
  0xa0   : > { %933 = vmatprep.subr.mxu0 %v1621_v9  ;;  %968 = vmatprep.subr.mxu1 %v1621_v9 }
  0xa3   : > { %934 = vmatpush3.xpose.msra.mxu0 %v1621_v9  ;;  %969 = vmatpush3.xpose.msra.mxu1 %v1621_v9 }
  0xa4   : > { %935 = vmatprep.subr.mxu0 %v1627_v10  ;;  %970 = vmatprep.subr.mxu1 %v1627_v10 }
  0xa7   : > { %936 = vmatpush3.xpose.msra.mxu0 %v1627_v10  ;;  %971 = vmatpush3.xpose.msra.mxu1 %v1627_v10 }
  0xa8   : > { %937 = vmatprep.subr.mxu0 %v372_v11  ;;  %972 = vmatprep.subr.mxu1 %v372_v11 }
  0xab   : > { %938 = vmatpush3.xpose.msra.mxu0 %v372_v11  ;;  %973 = vmatpush3.xpose.msra.mxu1 %v372_v11 }
  0xac   : > { %939 = vmatprep.subr.mxu0 %v371_v12  ;;  %974 = vmatprep.subr.mxu1 %v371_v12 }
  0xaf   : > { %940 = vmatpush3.xpose.msra.mxu0 %v371_v12  ;;  %975 = vmatpush3.xpose.msra.mxu1 %v371_v12 }
  0xb0   : > { %941 = vmatprep.subr.mxu0 %v370_v13  ;;  %976 = vmatprep.subr.mxu1 %v370_v13 }
  0xb3   : > { %942 = vmatpush3.xpose.msra.mxu0 %v370_v13  ;;  %977 = vmatpush3.xpose.msra.mxu1 %v370_v13 }
  0xb4   : > { %943 = vmatprep.subr.mxu0 %v369_v14  ;;  %978 = vmatprep.subr.mxu1 %v369_v14 }
  0xb7   : > { %944 = vmatpush3.xpose.msra.mxu0 %v369_v14  ;;  %979 = vmatpush3.xpose.msra.mxu1 %v369_v14 }
  0xb8   : > { %945 = vmatprep.subr.mxu0 %v368_v15  ;;  %980 = vmatprep.subr.mxu1 %v368_v15 }
  0xbb   : > { %946 = vmatpush3.xpose.msra.mxu0 %v368_v15  ;;  %981 = vmatpush3.xpose.msra.mxu1 %v368_v15 }
  0xbc   : > { %947 = vmatprep.subr.mxu0 %v367_v16  ;;  %982 = vmatprep.subr.mxu1 %v367_v16 }
  0xbf   : > { %948 = vmatpush3.xpose.msra.mxu0 %v367_v16  ;;  %983 = vmatpush3.xpose.msra.mxu1 %v367_v16 }
  0xc0   : > { %949 = vmatprep.subr.mxu0 %v366_v17  ;;  %984 = vmatprep.subr.mxu1 %v366_v17 }
  0xc3   : > { %950 = vmatpush3.xpose.msra.mxu0 %v366_v17  ;;  %985 = vmatpush3.xpose.msra.mxu1 %v366_v17 }
  0xc4   : > { %989 = vmatprep.subr.mxu0 %v1571_v0 }
  0xc6   : > { %952 = vmatmul.mubr.f32.vlgmr.msra.gmra.mxu0 %v1637_v18  ;;  %987 = vmatmul.mubr.f32.vlgmr.msra.gmra.mxu1 %v1641_v19 }
  0xc7   : > { %990 = vmatpush3.xpose.msra.mxu0 %v1571_v0  ;;  %1021 = vmatprep.mubr.f32.mxu0 %v1646_v20 }
  0xc8   : > { %991 = vmatprep.subr.mxu0 %v1573_v1 }
  0xcb   : > { %992 = vmatpush3.xpose.msra.mxu0 %v1573_v1 }
  0xcc   : > { %993 = vmatprep.subr.mxu0 %v1581_v2 }
  0xcf   : > { %994 = vmatpush3.xpose.msra.mxu0 %v1581_v2 }
  0xd0   : > { %995 = vmatprep.subr.mxu0 %v1595_v5 }
  0xd3   : > { %996 = vmatpush3.xpose.msra.mxu0 %v1595_v5 }
  0xd4   : > { %997 = vmatprep.subr.mxu0 %v1603_v6 }
  0xd7   : > { %998 = vmatpush3.xpose.msra.mxu0 %v1603_v6 }
  0xd8   : > { %999 = vmatprep.subr.mxu0 %v1609_v7 }
  0xdb   : > { %1000 = vmatpush3.xpose.msra.mxu0 %v1609_v7 }
  0xdc   : > { %1001 = vmatprep.subr.mxu0 %v1615_v8 }
  0xdf   : > { %1002 = vmatpush3.xpose.msra.mxu0 %v1615_v8 }
  0xe0   : > { %1003 = vmatprep.subr.mxu0 %v1621_v9 }
  0xe3   : > { %1004 = vmatpush3.xpose.msra.mxu0 %v1621_v9 }
  0xe4   : > { %1005 = vmatprep.subr.mxu0 %v1627_v10 }
  0xe7   : > { %1006 = vmatpush3.xpose.msra.mxu0 %v1627_v10 }
  0xe8   : > { %1007 = vmatprep.subr.mxu0 %v372_v11 }
  0xeb   : > { %1008 = vmatpush3.xpose.msra.mxu0 %v372_v11 }
  0xec   : > { %1009 = vmatprep.subr.mxu0 %v371_v12 }
  0xef   : > { %1010 = vmatpush3.xpose.msra.mxu0 %v371_v12 }
  0xf0   : > { %1011 = vmatprep.subr.mxu0 %v370_v13 }
  0xf3   : > { %1012 = vmatpush3.xpose.msra.mxu0 %v370_v13 }
  0xf4   : > { %1013 = vmatprep.subr.mxu0 %v369_v14 }
  0xf7   : > { %1014 = vmatpush3.xpose.msra.mxu0 %v369_v14 }
  0xf8   : > { %1015 = vmatprep.subr.mxu0 %v368_v15 }
  0xfb   : > { %1016 = vmatpush3.xpose.msra.mxu0 %v368_v15 }
  0xfc   : > { %1017 = vmatprep.subr.mxu0 %v367_v16 }
  0xff   : > { %1018 = vmatpush3.xpose.msra.mxu0 %v367_v16 }
 0x100   : > { %1019 = vmatprep.subr.mxu0 %v366_v17 }
 0x103   : > { %1020 = vmatpush3.xpose.msra.mxu0 %v366_v17 }
 0x106   : > { %1022 = vmatmul.mubr.f32.vlgmr.msra.gmra.mxu0 %v1670_v21 }
 0x186   : > { %v953_v23 = vpop.f32.mrf.mxu0  ;;  %v988_v24 = vpop.f32.mrf.mxu1 }
 0x187   : > { %v468_v25 = vadd.f32 %v953_v23, %v854_v22  ;;  %v557_v26 = vadd.f32 %v988_v24, %v854_v22 }
 0x188   : > { %v462_v27 = vpop.f32.mrf.mxu0  ;;  %v551_v28 = vpop.f32.mrf.mxu1 }
 0x189   : > { %v472_v30 = vmax.f32 %v468_v25, 0.0  ;;  %v561_v31 = vmax.f32 %v557_v26, 0.0  ;;  %v463_v32 = vadd.f32 %v854_v22, %v462_v27  ;;  %v552_v33 = vadd.f32 %v854_v22, %v551_v28 }
 0x18b   : > { %v471_v34 = vmax.f32 %v463_v32, 0.0  ;;  %v560_v35 = vmax.f32 %v552_v33, 0.0  ;;  %v563_v36 = vmul.f32 %v855_v29, %v561_v31  ;;  %v480_v37 = vmul.f32 %v855_v29, %v472_v30 }
 0x18d   : > { %566 = vadd.xlane.f32.xlu1 %v563_v36  ;;  %483 = vadd.xlane.f32.xlu0 %v480_v37  ;;  %v562_v38 = vmul.f32 %v855_v29, %v560_v35  ;;  %v479_v39 = vmul.f32 %v855_v29, %v471_v34 }
 0x191   : > { %564 = vadd.xlane.f32.xlu1 %v562_v38  ;;  %481 = vadd.xlane.f32.xlu0 %v479_v39 }
 0x1c6   : > { %v1023_v40 = vpop.f32.mrf.mxu0 }
 0x1c7   : > { %v640_v41 = vadd.f32 %v1023_v40, %v854_v22 }
 0x1c8   : > { %v634_v42 = vpop.f32.mrf.mxu0 }
 0x1c9   : > { %v644_v43 = vmax.f32 %v640_v41, 0.0  ;;  %v635_v44 = vadd.f32 %v854_v22, %v634_v42 }
 0x1cb   : > { %v643_v45 = vmax.f32 %v635_v44, 0.0  ;;  %v646_v46 = vmul.f32 %v855_v29, %v644_v43 }
 0x1cd   : > { %649 = vadd.xlane.f32.xlu1 %v646_v46  ;;  %v645_v47 = vmul.f32 %v855_v29, %v643_v45 }
 0x1cf   : > { %647 = vadd.xlane.f32.xlu0 %v645_v47 }
 0x216   : > { %v567_v48 = vpop.xlane.xlu1 %566  ;;  %v484_v49 = vpop.xlane.xlu0 %483 }
 0x217   : > { %v652_v52 = vmax.f32 %v484_v49, %v567_v48 }
 0x21a   : > { %v565_v50 = vpop.xlane.xlu1 %564  ;;  %v482_v51 = vpop.xlane.xlu0 %481 }
 0x21b   : > { %v651_v54 = vmax.f32 %v482_v51, %v565_v50 }
 0x256   : > { %v650_v53 = vpop.xlane.xlu1 %649 }
 0x257   : > { %v654_v55 = vmax.f32 %v652_v52, %v650_v53 }
 0x258   : > { %v648_v56 = vpop.xlane.xlu0 %647 }
 0x259   : > { %v656_v57 = vsub.f32 %v484_v49, %v654_v55  ;;  %v662_v58 = vsub.f32 %v567_v48, %v654_v55  ;;  %v668_v59 = vsub.f32 %v650_v53, %v654_v55  ;;  %v653_v60 = vmax.f32 %v651_v54, %v648_v56 }
 0x25b   : > { %v659_v61 = vmul.f32 1.442695, %v656_v57  ;;  %v665_v62 = vmul.f32 1.442695, %v662_v58  ;;  %v671_v63 = vmul.f32 1.442695, %v668_v59  ;;  %v655_v0 = vsub.f32 %v482_v51, %v653_v60 }
 0x25c   : > { %v661_v1 = vsub.f32 %v565_v50, %v653_v60  ;;  %v667_v2 = vsub.f32 %v648_v56, %v653_v60 }
 0x25d   : > { %1095 = vpow2.f32 %v659_v61  ;;  %v657_v5 = vmul.f32 1.442695, %v655_v0 }
 0x25e   : > { %1097 = vpow2.f32 %v665_v62  ;;  %v663_v6 = vmul.f32 1.442695, %v661_v1  ;;  %v669_v7 = vmul.f32 1.442695, %v667_v2 }
 0x25f   : > { %1099 = vpow2.f32 %v671_v63 }
 0x260   : > { %1101 = vpow2.f32 %v657_v5 }
 0x261   : > { %1103 = vpow2.f32 %v663_v6 }
 0x262   : > { %1105 = vpow2.f32 %v669_v7 }
 0x26a   : > { %v1096_v8 = vpop.eup %1095 }
 0x26b   : > { %v1098_v9 = vpop.eup %1097  ;;  %v682_v22 = vmul.f32 %v1096_v8, %v1637_v18 }
 0x26c   : > { %v1100_v10 = vpop.eup %1099  ;;  %v674_v11 = vadd.f32 %v1098_v9, %v1096_v8  ;;  %v684_v23 = vmul.f32 %v1098_v9, %v1641_v19 }
 0x26d   : > { %v1102_v12 = vpop.eup %1101  ;;  %v688_v27 = vmul.f32 %v1100_v10, %v1670_v21 }
 0x26e   : > { %v1104_v13 = vpop.eup %1103  ;;  %v676_v14 = vadd.f32 %v1100_v10, %v674_v11  ;;  %v681_v24 = vmul.f32 %v1102_v12, %v1585_v3  ;;  %v686_v26 = vadd.f32 %v684_v23, %v682_v22 }
 0x26f   : > { %v673_v15 = vadd.f32 %v1104_v13, %v1102_v12  ;;  %v1106_v16 = vpop.eup %1105  ;;  %v683_v25 = vmul.f32 %v1104_v13, %v1589_v4 }
 0x270   : > { %1107 = vrcp.f32 %v676_v14  ;;  %v690_v29 = vadd.f32 %v688_v27, %v686_v26  ;;  %v687_v31 = vmul.f32 %v1106_v16, %v1646_v20 }
 0x271   : > { %v675_v17 = vadd.f32 %v1106_v16, %v673_v15  ;;  %v685_v28 = vadd.f32 %v683_v25, %v681_v24 }
 0x273   : > { %1109 = vrcp.f32 %v675_v17  ;;  %v689_v32 = vadd.f32 %v687_v31, %v685_v28 }
 0x27d   : > { %v1108_v30 = vpop.eup %1107 }
 0x27e   : > { %v692_v18 = vmul.f32 %v1108_v30, %v690_v29 }
 0x280   : > { %v1110_v19 = vpop.eup %1109  ;;  %694 = vst [vmem:[%s361_s23 + $0x8] sm:$0xff] %v692_v18 }
 0x281   : > { %v691_v3 = vmul.f32 %v1110_v19, %v689_v32 }
 0x283   : > { %693 = vst [vmem:[%s361_s23] sm:$0xff] %v691_v3 }
 0x284   : > { %1234 = shalt.err (!%p1231_p4)
}
 0x285   : > { %s1235_s8 = scalar_lea.hbm %s1690_s10, 256  ;;  %s1239_s25 = scalar_lea.hbm %s1740_s6, 1024 }
 0x286   : > { %p1236_p8 = scmp.ne.s32.totalorder %s1690_s10, %s1235_s8  ;;  %p1240_p11 = scmp.lt.s32.totalorder %s1690_s10, %s1740_s6 }
 0x287   : > { %p1241_p5 = scmp.lt.s32.totalorder %s1239_s25, %s1235_s8 }
 0x288   : > { %p1237_p10 = pnand %p1236_p8, %p1778_p3 }
 0x289   : > { %p1242_p12 = por %p1241_p5, %p1240_p11 }
 0x28a   : > { %p1238_p7 = pneg %p1237_p10 }
 0x28c   : > { %p1243_p2 = pnand %p1242_p12, %p1238_p7 }
 0x28e   : > { %1246 = shalt.err (!%p1243_p2)
}
 0x28f   : > { %s1302_s16 = smov 128   ;;  %s1303_s20 = smov 8  }
 0x290   : > { %1034 = dma.vmem_to_hbm [thread:$0]  (%p1778_p3), %s1692_s14, 256, %s1690_s10, %s696_s1, %s1302_s16, %s1302_s16, %s1303_s20  }
 0x291 PF: > { %s1779_s29 = sld [smem:[#allocation18_spill]]  ;;  %p1057_p6 = scmp.ge.s32.totalorder %s1293_s24, 2 }
 0x292   : > { %s724_s13 = sand.u32 1, %s1281_s21  }
 0x293   : > { %s725_s23 = scalar_lea.sflag [#allocation4], %s724_s13 }
 0x297   : > { %p1780_p9 = scmp.ne.s32.totalorder %s1779_s29, 0 }
 0x299   : > { %p1051_p0 = pnand %p1057_p6, %p1780_p9 }
 0x29b   : > { %p1052_p13 = pneg %p1051_p0 }
 0x29d   : > { %1276 = dma.done.wait (%p1052_p13), %s725_s23, 256  }
 0x29e   : > { %1278 = vsyncadd (%p1052_p13), %s725_s23, 4294967040  ;;  %s1781_s24 = sld [smem:[#allocation16_spill]]  ;;  %s1784_s21 = smov %s1285_s22 }
 0x29f   : > { %s1782_s9 = sld [smem:[#allocation15_spill]] }
 0x2a0   : > { %s1783_s23 = sld [smem:[#allocation17_spill]] }
 0x2a4   : > { %p23_p1 = scmp.ge.s32.totalorder %s1781_s24, 6  }
 0x2a5   : > { %s1785_s22 = smov %s1782_s9 }
 0x2a6   :  { %25 = sbr.rel (!%p23_p1) target bundleno = 10 (0xa), region = 117 }
 0x2ab   :  { %730 = vsyncpa [#allocation3], 1 }
 0x2ac   :  { %732 = vsyncpa [#allocation3 + $0x1], 1 }
 0x2ad   :  { %733 = vsyncpa [#allocation6], 1 }
 0x2ae   :  { %735 = vsyncpa [#allocation6 + $0x1], 1 }
 0x2af   :  { %736 = vsyncpa [#allocation9], 1 }
 0x2b0   :  { %737 = vsyncpa [#allocation4], 1 }
 0x2b1   :  { %739 = vsyncpa [#allocation4 + $0x1], 1 }

</bundles_post_ra>
